<compile_context>
chip_gen: v7x
topology: tpu7x:2x2x1
jax: 0.10.0
libtpu: 0.0.40
codegen_flags: <defaults>
</compile_context>

<pallas_src>
import jax
import jax.numpy as jnp
from jax.experimental import pallas as pl
from jax.experimental.pallas import tpu as pltpu

LANE = 128      # vreg lane width   (last dim)
MXU_ROWS = 128  # row-tile granularity (MXU height)


def _round_up(x, m):
    return ((x + m - 1) // m) * m


def _pad2d(x, rows, cols):
    r, c = x.shape
    return jnp.pad(x, ((0, rows - r), (0, cols - c)))


def _vmem_budget_bytes():
    """Per-generation VMEM budget: ~3/4 of physical, capped at 100 MiB."""
    cap = 64 * 1024 * 1024  # conservative default (v7x physical)
    try:
        info = pltpu.get_tpu_info()
        cap = int(getattr(info, "vmem_capacity_bytes", cap))
    except Exception:
        pass
    return min((cap * 3) // 4, 100 * 1024 * 1024)


def _fused_vmem_bytes(n_p, fin_p, hid_p, cls_p):
    """Rough upper bound on VMEM needed by the fully fused kernel."""
    b = n_p * n_p * 2                                            # A_hat (bf16)
    b += n_p * fin_p * 2                                         # X (bf16)
    b += (fin_p * hid_p + hid_p * hid_p + hid_p * cls_p) * 2     # W1..W3
    b += (2 * hid_p + cls_p) * 4                                 # biases
    b += n_p * cls_p * 4                                         # output (f32)
    b += 3 * n_p * max(hid_p, cls_p) * 4                         # intermediates
    return b


# ---------------------------------------------------------------------------
# Fused single-kernel path: whole 3-layer GCN, A_hat VMEM-resident, read once.
# ---------------------------------------------------------------------------
def _gcn_fused_kernel(x_ref, a_ref, w1_ref, b1_ref, w2_ref, b2_ref,
                      w3_ref, b3_ref, o_ref):
    # layer 1: relu(A @ (X @ W1) + b1)
    xw = jnp.dot(x_ref[...], w1_ref[...], preferred_element_type=jnp.float32)
    h = jnp.dot(a_ref[...], xw.astype(jnp.bfloat16),
                preferred_element_type=jnp.float32)
    h = jnp.maximum(h + b1_ref[...], 0.0).astype(jnp.bfloat16)
    # (dropout, training=False -> identity)
    # layer 2: relu(A @ (H @ W2) + b2)
    xw = jnp.dot(h, w2_ref[...], preferred_element_type=jnp.float32)
    h = jnp.dot(a_ref[...], xw.astype(jnp.bfloat16),
                preferred_element_type=jnp.float32)
    h = jnp.maximum(h + b2_ref[...], 0.0).astype(jnp.bfloat16)
    # layer 3: log_softmax(A @ (H @ W3) + b3); padded class lanes carry -1e30
    # in b3 so they vanish from the softmax denominator (no in-kernel mask).
    xw = jnp.dot(h, w3_ref[...], preferred_element_type=jnp.float32)
    logits = jnp.dot(a_ref[...], xw.astype(jnp.bfloat16),
                     preferred_element_type=jnp.float32) + b3_ref[...]
    m = jnp.max(logits, axis=1, keepdims=True)
    s = logits - m
    lse = jnp.log(jnp.sum(jnp.exp(s), axis=1, keepdims=True))
    o_ref[...] = s - lse


def gcn_fused(x_p, a_p, w1_p, b1_p, w2_p, b2_p, w3_p, b3_p, *, vmem_limit):
    n_p = a_p.shape[0]
    cls_p = w3_p.shape[1]
    vmem_spec = pl.BlockSpec(memory_space=pltpu.MemorySpace.VMEM)
    return pl.pallas_call(
        _gcn_fused_kernel,
        out_shape=jax.ShapeDtypeStruct((n_p, cls_p), jnp.float32),
        in_specs=[vmem_spec] * 8,
        out_specs=vmem_spec,
        compiler_params=pltpu.CompilerParams(vmem_limit_bytes=vmem_limit),
    )(x_p, a_p, w1_p, b1_p, w2_p, b2_p, w3_p, b3_p)


# ---------------------------------------------------------------------------
# Tiled fallback kernels (graphs too large for a VMEM-resident A_hat).
# ---------------------------------------------------------------------------
def _xw_kernel(x_ref, w_ref, o_ref):
    o_ref[...] = jnp.dot(
        x_ref[...], w_ref[...], preferred_element_type=jnp.float32
    ).astype(o_ref.dtype)


def feature_transform(x_bf16, w_bf16, *, tm, vmem_limit):
    n_p, fin_p = x_bf16.shape
    fout = w_bf16.shape[1]
    return pl.pallas_call(
        _xw_kernel,
        out_shape=jax.ShapeDtypeStruct((n_p, fout), jnp.bfloat16),
        grid=(n_p // tm,),
        in_specs=[
            pl.BlockSpec((tm, fin_p), lambda i: (i, 0)),    # X row stripe
            pl.BlockSpec((fin_p, fout), lambda i: (0, 0)),  # W (resident)
        ],
        out_specs=pl.BlockSpec((tm, fout), lambda i: (i, 0)),
        compiler_params=pltpu.CompilerParams(
            dimension_semantics=("parallel",),
            vmem_limit_bytes=vmem_limit),
    )(x_bf16, w_bf16)


def _agg_relu_next_kernel(a_ref, xw_ref, b_ref, wn_ref, o_ref):
    # out_tile = relu(A_tile @ XW + b) @ W_next   (next-layer transform fused)
    h = jnp.dot(a_ref[...], xw_ref[...], preferred_element_type=jnp.float32)
    h = jnp.maximum(h + b_ref[...], 0.0)
    o_ref[...] = jnp.dot(h.astype(jnp.bfloat16), wn_ref[...],
                         preferred_element_type=jnp.float32).astype(o_ref.dtype)


def aggregate_relu_then_transform(a_bf16, xw_bf16, b_f32, w_next_bf16, *,
                                  tm, vmem_limit):
    n_p = a_bf16.shape[0]
    fmid = xw_bf16.shape[1]
    fnext = w_next_bf16.shape[1]
    return pl.pallas_call(
        _agg_relu_next_kernel,
        out_shape=jax.ShapeDtypeStruct((n_p, fnext), jnp.bfloat16),
        grid=(n_p // tm,),
        in_specs=[
            pl.BlockSpec((tm, n_p), lambda i: (i, 0)),      # A_hat row stripe
            pl.BlockSpec((n_p, fmid), lambda i: (0, 0)),    # XW (resident)
            pl.BlockSpec((1, fmid), lambda i: (0, 0)),      # bias (resident)
            pl.BlockSpec((fmid, fnext), lambda i: (0, 0)),  # W_next (resident)
        ],
        out_specs=pl.BlockSpec((tm, fnext), lambda i: (i, 0)),
        compiler_params=pltpu.CompilerParams(
            dimension_semantics=("parallel",),
            vmem_limit_bytes=vmem_limit),
    )(a_bf16, xw_bf16, b_f32, w_next_bf16)


def _agg_logsoftmax_kernel(a_ref, xw_ref, b_ref, o_ref):
    logits = jnp.dot(a_ref[...], xw_ref[...], preferred_element_type=jnp.float32)
    logits = logits + b_ref[...]       # padded class lanes carry -1e30 bias
    m = jnp.max(logits, axis=1, keepdims=True)
    s = logits - m
    lse = jnp.log(jnp.sum(jnp.exp(s), axis=1, keepdims=True))
    o_ref[...] = (s - lse).astype(o_ref.dtype)


def aggregate_log_softmax(a_bf16, xw_bf16, b_f32, *, tm, vmem_limit):
    n_p = a_bf16.shape[0]
    fout = xw_bf16.shape[1]
    return pl.pallas_call(
        _agg_logsoftmax_kernel,
        out_shape=jax.ShapeDtypeStruct((n_p, fout), jnp.float32),
        grid=(n_p // tm,),
        in_specs=[
            pl.BlockSpec((tm, n_p), lambda i: (i, 0)),
            pl.BlockSpec((n_p, fout), lambda i: (0, 0)),
            pl.BlockSpec((1, fout), lambda i: (0, 0)),
        ],
        out_specs=pl.BlockSpec((tm, fout), lambda i: (i, 0)),
        compiler_params=pltpu.CompilerParams(
            dimension_semantics=("parallel",),
            vmem_limit_bytes=vmem_limit),
    )(a_bf16, xw_bf16, b_f32)


# ---------------------------------------------------------------------------
# Forward pass (matches the PyTorch GCN module, inference mode)
# ---------------------------------------------------------------------------
def gcn_forward(x, a_hat, params, *, block_rows=256, force_tiled=False):
    (w1, b1), (w2, b2), (w3, b3) = params
    n, fin = x.shape
    hid = w1.shape[1]
    ncls = w3.shape[1]

    fin_p = _round_up(fin, LANE)
    hid_p = _round_up(hid, LANE)
    cls_p = _round_up(ncls, LANE)
    budget = _vmem_budget_bytes()

    # Weights / biases, lane-padded.  b3's padded lanes get -1e30 so the
    # log_softmax needs no in-kernel class mask.
    w1_p = _pad2d(w1, fin_p, hid_p).astype(jnp.bfloat16)
    w2_p = _pad2d(w2, hid_p, hid_p).astype(jnp.bfloat16)
    w3_p = _pad2d(w3, hid_p, cls_p).astype(jnp.bfloat16)
    b1_p = _pad2d(b1.reshape(1, -1).astype(jnp.float32), 1, hid_p)
    b2_p = _pad2d(b2.reshape(1, -1).astype(jnp.float32), 1, hid_p)
    b3_p = jnp.full((1, cls_p), -1e30, jnp.float32).at[0, :ncls].set(
        b3.astype(jnp.float32))

    n_p_fused = _round_up(n, 256)
    use_fused = (not force_tiled) and (
        _fused_vmem_bytes(n_p_fused, fin_p, hid_p, cls_p) <= budget)

    if use_fused:
        # A_hat read from HBM exactly once; all intermediates stay in VMEM.
        n_p = n_p_fused
        x_p = _pad2d(x, n_p, fin_p).astype(jnp.bfloat16)
        a_p = _pad2d(a_hat, n_p, n_p).astype(jnp.bfloat16)
        out = gcn_fused(x_p, a_p, w1_p, b1_p, w2_p, b2_p, w3_p, b3_p,
                        vmem_limit=budget)
        return out[:n, :ncls]

    # ---- row-tiled fallback: 4 pallas_calls, H never round-trips HBM ----
    tm = max(MXU_ROWS, min(512, _round_up(block_rows, MXU_ROWS)))
    tm_last = min(tm, MXU_ROWS)   # smaller tile for the log_softmax epilogue
    n_p = _round_up(n, tm)
    x_p = _pad2d(x, n_p, fin_p).astype(jnp.bfloat16)
    a_p = _pad2d(a_hat, n_p, n_p).astype(jnp.bfloat16)

    xw = feature_transform(x_p, w1_p, tm=tm, vmem_limit=budget)       # X @ W1
    xw = aggregate_relu_then_transform(                               # relu(A@XW1+b1) @ W2
        a_p, xw, b1_p, w2_p, tm=tm, vmem_limit=budget)
    xw = aggregate_relu_then_transform(                               # relu(A@XW2+b2) @ W3
        a_p, xw, b2_p, w3_p, tm=tm, vmem_limit=budget)
    out = aggregate_log_softmax(                                      # log_softmax(A@XW3+b3)
        a_p, xw, b3_p, tm=tm_last, vmem_limit=budget)
    return out[:n, :ncls]


# ---------------------------------------------------------------------------
# Graph / param helpers (plain JAX glue)
# ---------------------------------------------------------------------------
def build_normalized_adjacency(edge_index, num_nodes):
    """Dense D^-1/2 (A + I) D^-1/2 from a [2, E] edge_index."""
    src, dst = edge_index[0], edge_index[1]
    adj = jnp.zeros((num_nodes, num_nodes), jnp.float32)
    adj = adj.at[src, dst].set(1.0)
    adj = adj + jnp.eye(num_nodes, dtype=jnp.float32)   # add self loops
    deg = jnp.sum(adj, axis=1)
    d_inv_sqrt = jnp.where(deg > 0, 1.0 / jnp.sqrt(deg), 0.0)
    return d_inv_sqrt[:, None] * adj * d_inv_sqrt[None, :]


def glorot(key, fan_in, fan_out):
    limit = jnp.sqrt(6.0 / (fan_in + fan_out))
    return jax.random.uniform(key, (fan_in, fan_out), jnp.float32,
                              minval=-limit, maxval=limit)


def gcn_reference(x, a_hat, params):
    (w1, b1), (w2, b2), (w3, b3) = params
    h = jnp.maximum(a_hat @ (x @ w1) + b1, 0.0)
    h = jnp.maximum(a_hat @ (h @ w2) + b2, 0.0)
    logits = a_hat @ (h @ w3) + b3
    return jax.nn.log_softmax(logits, axis=1)


if __name__ == "__main__":
    # Small synthetic "Cora-like" problem.
    NUM_NODES = 200
    NUM_FEATURES = 32   # dataset.num_node_features
    HIDDEN = 16
    NUM_CLASSES = 8     # dataset.num_classes

    key = jax.random.PRNGKey(0)
    k_x, k_w1, k_w2, k_w3 = jax.random.split(key, 4)

    # Node features.
    x = jax.random.normal(k_x, (NUM_NODES, NUM_FEATURES), jnp.float32)

    # Deterministic graph: a ring (both directions), as an edge_index [2, E].
    src = jnp.arange(NUM_NODES, dtype=jnp.int32)
    dst = (src + 1) % NUM_NODES
    edge_index = jnp.concatenate(
        [jnp.stack([src, dst]), jnp.stack([dst, src])], axis=1)  # [2, 2N]
    a_hat = build_normalized_adjacency(edge_index, NUM_NODES)

    # Deterministic parameter init (glorot weights, zero bias, like GCNConv).
    params = (
        (glorot(k_w1, NUM_FEATURES, HIDDEN), jnp.zeros((HIDDEN,), jnp.float32)),
        (glorot(k_w2, HIDDEN, HIDDEN), jnp.zeros((HIDDEN,), jnp.float32)),
        (glorot(k_w3, HIDDEN, NUM_CLASSES), jnp.zeros((NUM_CLASSES,), jnp.float32)),
    )

    ref = gcn_reference(x, a_hat, params)

    # Path 1: fully fused single kernel (A_hat resident in VMEM, read once).
    out_fused = jax.block_until_ready(gcn_forward(x, a_hat, params))
    assert out_fused.shape == (NUM_NODES, NUM_CLASSES)
    assert jnp.allclose(jnp.sum(jnp.exp(out_fused), axis=1), 1.0, atol=1e-3)
    assert jnp.allclose(out_fused, ref, atol=1e-1), \
        float(jnp.max(jnp.abs(out_fused - ref)))

    # Path 2: row-tiled fallback (for graphs too large for a resident A_hat).
    out_tiled = jax.block_until_ready(
        gcn_forward(x, a_hat, params, block_rows=128, force_tiled=True))
    assert out_tiled.shape == (NUM_NODES, NUM_CLASSES)
    assert jnp.allclose(jnp.sum(jnp.exp(out_tiled), axis=1), 1.0, atol=1e-3)
    assert jnp.allclose(out_tiled, ref, atol=1e-1), \
        float(jnp.max(jnp.abs(out_tiled - ref)))

    print("KERNEL_OK")
</pallas_src>

<mosaic_0001>
module attributes {stable_mosaic.version = 11 : i64} {
  func.func @_gcn_fused_kernel(%arg0: memref<256x128xbf16, #tpu.memory_space<vmem>>, %arg1: memref<256x256xbf16, #tpu.memory_space<vmem>>, %arg2: memref<128x128xbf16, #tpu.memory_space<vmem>>, %arg3: memref<1x128xf32, #tpu.memory_space<vmem>>, %arg4: memref<128x128xbf16, #tpu.memory_space<vmem>>, %arg5: memref<1x128xf32, #tpu.memory_space<vmem>>, %arg6: memref<128x128xbf16, #tpu.memory_space<vmem>>, %arg7: memref<1x128xf32, #tpu.memory_space<vmem>>, %arg8: memref<256x128xf32, #tpu.memory_space<vmem>>) attributes {dimension_semantics = [], scalar_prefetch = 0 : i64, scratch_operands = 0 : i64, tpu.core_type = #tpu.core_type<tc>} {
    %c0 = arith.constant 0 : index
    %c0_0 = arith.constant 0 : index
    %0 = vector.load %arg0[%c0, %c0_0] : memref<256x128xbf16, #tpu.memory_space<vmem>>, vector<256x128xbf16>
    %c0_1 = arith.constant 0 : index
    %c0_2 = arith.constant 0 : index
    %1 = vector.load %arg2[%c0_1, %c0_2] : memref<128x128xbf16, #tpu.memory_space<vmem>>, vector<128x128xbf16>
    %cst = arith.constant dense<0.000000e+00> : vector<256x128xf32>
    %2 = tpu.matmul %0, %1, %cst {dimension_numbers = #tpu.dot_dimension_numbers<[1], [0], [0], [1], [0, 0, 1, 1], [], []>} : vector<256x128xbf16>, vector<128x128xbf16>, vector<256x128xf32> -> vector<256x128xf32>
    %c0_3 = arith.constant 0 : index
    %c0_4 = arith.constant 0 : index
    %3 = vector.load %arg1[%c0_3, %c0_4] : memref<256x256xbf16, #tpu.memory_space<vmem>>, vector<256x256xbf16>
    %4 = arith.truncf %2 : vector<256x128xf32> to vector<256x128xbf16>
    %cst_5 = arith.constant dense<0.000000e+00> : vector<256x128xf32>
    %5 = tpu.matmul %3, %4, %cst_5 {dimension_numbers = #tpu.dot_dimension_numbers<[1], [0], [0], [1], [0, 0, 1, 1], [], []>} : vector<256x256xbf16>, vector<256x128xbf16>, vector<256x128xf32> -> vector<256x128xf32>
    %c0_6 = arith.constant 0 : index
    %c0_7 = arith.constant 0 : index
    %6 = vector.load %arg3[%c0_6, %c0_7] : memref<1x128xf32, #tpu.memory_space<vmem>>, vector<1x128xf32>
    %7 = vector.broadcast %6 : vector<1x128xf32> to vector<256x128xf32>
    %8 = arith.addf %5, %7 : vector<256x128xf32>
    %cst_8 = arith.constant 0.000000e+00 : f32
    %9 = vector.broadcast %cst_8 : f32 to vector<256x128xf32>
    %10 = arith.maximumf %8, %9 : vector<256x128xf32>
    %11 = arith.truncf %10 : vector<256x128xf32> to vector<256x128xbf16>
    %c0_9 = arith.constant 0 : index
    %c0_10 = arith.constant 0 : index
    %12 = vector.load %arg4[%c0_9, %c0_10] : memref<128x128xbf16, #tpu.memory_space<vmem>>, vector<128x128xbf16>
    %cst_11 = arith.constant dense<0.000000e+00> : vector<256x128xf32>
    %13 = tpu.matmul %11, %12, %cst_11 {dimension_numbers = #tpu.dot_dimension_numbers<[1], [0], [0], [1], [0, 0, 1, 1], [], []>} : vector<256x128xbf16>, vector<128x128xbf16>, vector<256x128xf32> -> vector<256x128xf32>
    %c0_12 = arith.constant 0 : index
    %c0_13 = arith.constant 0 : index
    %14 = vector.load %arg1[%c0_12, %c0_13] : memref<256x256xbf16, #tpu.memory_space<vmem>>, vector<256x256xbf16>
    %15 = arith.truncf %13 : vector<256x128xf32> to vector<256x128xbf16>
    %cst_14 = arith.constant dense<0.000000e+00> : vector<256x128xf32>
    %16 = tpu.matmul %14, %15, %cst_14 {dimension_numbers = #tpu.dot_dimension_numbers<[1], [0], [0], [1], [0, 0, 1, 1], [], []>} : vector<256x256xbf16>, vector<256x128xbf16>, vector<256x128xf32> -> vector<256x128xf32>
    %c0_15 = arith.constant 0 : index
    %c0_16 = arith.constant 0 : index
    %17 = vector.load %arg5[%c0_15, %c0_16] : memref<1x128xf32, #tpu.memory_space<vmem>>, vector<1x128xf32>
    %18 = vector.broadcast %17 : vector<1x128xf32> to vector<256x128xf32>
    %19 = arith.addf %16, %18 : vector<256x128xf32>
    %cst_17 = arith.constant 0.000000e+00 : f32
    %20 = vector.broadcast %cst_17 : f32 to vector<256x128xf32>
    %21 = arith.maximumf %19, %20 : vector<256x128xf32>
    %22 = arith.truncf %21 : vector<256x128xf32> to vector<256x128xbf16>
    %c0_18 = arith.constant 0 : index
    %c0_19 = arith.constant 0 : index
    %23 = vector.load %arg6[%c0_18, %c0_19] : memref<128x128xbf16, #tpu.memory_space<vmem>>, vector<128x128xbf16>
    %cst_20 = arith.constant dense<0.000000e+00> : vector<256x128xf32>
    %24 = tpu.matmul %22, %23, %cst_20 {dimension_numbers = #tpu.dot_dimension_numbers<[1], [0], [0], [1], [0, 0, 1, 1], [], []>} : vector<256x128xbf16>, vector<128x128xbf16>, vector<256x128xf32> -> vector<256x128xf32>
    %c0_21 = arith.constant 0 : index
    %c0_22 = arith.constant 0 : index
    %25 = vector.load %arg1[%c0_21, %c0_22] : memref<256x256xbf16, #tpu.memory_space<vmem>>, vector<256x256xbf16>
    %26 = arith.truncf %24 : vector<256x128xf32> to vector<256x128xbf16>
    %cst_23 = arith.constant dense<0.000000e+00> : vector<256x128xf32>
    %27 = tpu.matmul %25, %26, %cst_23 {dimension_numbers = #tpu.dot_dimension_numbers<[1], [0], [0], [1], [0, 0, 1, 1], [], []>} : vector<256x256xbf16>, vector<256x128xbf16>, vector<256x128xf32> -> vector<256x128xf32>
    %c0_24 = arith.constant 0 : index
    %c0_25 = arith.constant 0 : index
    %28 = vector.load %arg7[%c0_24, %c0_25] : memref<1x128xf32, #tpu.memory_space<vmem>>, vector<1x128xf32>
    %29 = vector.broadcast %28 : vector<1x128xf32> to vector<256x128xf32>
    %30 = arith.addf %27, %29 : vector<256x128xf32>
    %cst_26 = arith.constant dense<0xFF800000> : vector<256xf32>
    %31 = vector.multi_reduction <maximumf>, %30, %cst_26 [1] : vector<256x128xf32> to vector<256xf32>
    %32 = vector.shape_cast %31 : vector<256xf32> to vector<256x1xf32>
    %33 = vector.broadcast %32 : vector<256x1xf32> to vector<256x128xf32>
    %34 = arith.subf %30, %33 : vector<256x128xf32>
    %35 = math.exp %34 : vector<256x128xf32>
    %cst_27 = arith.constant dense<0.000000e+00> : vector<256xf32>
    %36 = vector.multi_reduction <add>, %35, %cst_27 [1] : vector<256x128xf32> to vector<256xf32>
    %37 = vector.shape_cast %36 : vector<256xf32> to vector<256x1xf32>
    %38 = math.log %37 : vector<256x1xf32>
    %39 = vector.broadcast %38 : vector<256x1xf32> to vector<256x128xf32>
    %40 = arith.subf %34, %39 : vector<256x128xf32>
    %c0_28 = arith.constant 0 : index
    %c0_29 = arith.constant 0 : index
    %41 = vector.load %arg8[%c0_28, %c0_29] : memref<256x128xf32, #tpu.memory_space<vmem>>, vector<256x128xf32>
    tpu.vector_store %arg8[%c0_28, %c0_29], %40 {strides = array<i32>} : memref<256x128xf32, #tpu.memory_space<vmem>>, vector<256x128xf32>,
    return
  }
}

</mosaic_0001>

<bundles_post_ra>
// kernel: tpu_custom_call.1
= control target key start
LH: loop header
LB: loop body
LE: loop exit
PB: predicated region body
PF: predicated region fallthrough
CT: control target
= control target key end

     0   :  { %13 = vsyncpa [#allocation3], 0  ;;  %s3797_s0 = inlined_call_operand.hbm [shape: bf16[256,128], index: 0, kind: input, shape index: {}]   ;;  %s3798_s1 = inlined_call_operand.hbm [shape: bf16[256,256], index: 1, kind: input, shape index: {}]   ;;  %s3799_s2 = inlined_call_operand.hbm [shape: bf16[128,128], index: 2, kind: input, shape index: {}]   ;;  %s3800_s3 = inlined_call_operand.vmem [shape: f32[1,128], index: 3, kind: input, shape index: {}]   ;;  %s3801_s4 = inlined_call_operand.hbm [shape: bf16[128,128], index: 4, kind: input, shape index: {}]   ;;  %s3802_s5 = inlined_call_operand.vmem [shape: f32[1,128], index: 5, kind: input, shape index: {}]   ;;  %s3803_s6 = inlined_call_operand.hbm [shape: bf16[128,128], index: 6, kind: input, shape index: {}]   ;;  %s3804_s7 = inlined_call_operand.vmem [shape: f32[1,128], index: 7, kind: input, shape index: {}]   ;;  %s3805_s8 = inlined_call_operand.hbm [shape: f32[256,128], index: 8, kind: output, shape index: {}]  }
   0x1   :  { %14 = vsyncpa [#allocation6], 0 }
   0x2   :  { %15 = vsyncpa [#allocation9], 0 }
   0x3   :  { %16 = vsyncpa [#allocation4], 0  ;;  %s3154_s27 = smov [#allocation5]   ;;  %s3014_s9 = scalar_lea.hbm %s3798_s1, 4096 }
   0x4   :  { %s34_s28 = sshll.u32 %s3154_s27, 4  ;;  %p3015_p0 = scmp.ne.s32.totalorder %s3798_s1, %s3014_s9  ;;  %s35_s28 = int_to_ptr.vmem [resolvable:$true] %s34_s28 }
   0x5   :  { %p3018_p1 = scmp.lt.u32.totalorder %s3014_s9, %s3798_s1 }
   0x7   :  { %p3020_p2 = pnand %p3018_p1, %p3015_p0 }
   0x9   :  { %3023 = shalt.err (!%p3020_p2)
}
   0xa   :  { %s3024_s14 = scalar_lea.vmem %s35_s28, 4096  ;;  %p3029_p4 = scmp.lt.s32.totalorder %s35_s28, %s35_s28 }
   0xb   :  { %p3025_p3 = scmp.ne.s32.totalorder %s35_s28, %s3024_s14  ;;  %p3030_p5 = scmp.lt.s32.totalorder %s3024_s14, %s3024_s14 }
   0xd   :  { %p3031_p6 = por %p3030_p5, %p3029_p4 }
   0xf   :  { %p3032_p7 = pnand %p3031_p6, %p3025_p3 }
  0x11   :  { %3035 = shalt.err (!%p3032_p7)
}
  0x12   :  { %s3155_s15 = smov 128   ;;  %s3156_s16 = smov 8  }
  0x13   :  { %40 = dma.hbm_to_vmem [thread:$0]  %s3798_s1, 4096, %s35_s28, [#allocation6], %s3155_s15, %s3155_s15, %s3156_s16  }
  0x14   :  { %s3157_s19 = smov [#allocation8]   ;;  %s3158_s21 = smov [#allocation2]  }
  0x15   :  { %s60_s20 = sshll.u32 %s3157_s19, 4  ;;  %s22_s22 = sshll.u32 %s3158_s21, 4  ;;  %s61_s20 = int_to_ptr.vmem [resolvable:$true] %s60_s20  ;;  %s23_s22 = int_to_ptr.vmem [resolvable:$true] %s22_s22 }
  0x16   :  { %s3036_s25 = scalar_lea.hbm %s3801_s4, 1024 }
  0x17   :  { %p3037_p8 = scmp.ne.s32.totalorder %s3801_s4, %s3036_s25  ;;  %p3040_p9 = scmp.lt.u32.totalorder %s3036_s25, %s3801_s4 }
  0x19   :  { %p3042_p10 = pnand %p3040_p9, %p3037_p8 }
  0x1b   :  { %3045 = shalt.err (!%p3042_p10)
}
  0x1c   :  { %s3046_s1 = scalar_lea.vmem %s61_s20, 1024  ;;  %p3051_p12 = scmp.lt.s32.totalorder %s61_s20, %s61_s20 }
  0x1d   :  { %p3047_p11 = scmp.ne.s32.totalorder %s61_s20, %s3046_s1  ;;  %p3052_p13 = scmp.lt.s32.totalorder %s3046_s1, %s3046_s1 }
  0x1f   :  { %p3053_p0 = por %p3052_p13, %p3051_p12 }
  0x21   :  { %p3054_p1 = pnand %p3053_p0, %p3047_p11 }
  0x23   :  { %3057 = shalt.err (!%p3054_p1)
}
  0x24   :  { %s3159_s28 = smov 64   ;;  %s3160_s9 = smov 4  }
  0x25   :  { %66 = dma.hbm_to_vmem [thread:$0]  %s3801_s4, 1024, %s61_s20, [#allocation9], %s3159_s28, %s3159_s28, %s3160_s9  }
  0x26   :  { %s3058_s14 = scalar_lea.hbm %s3797_s0, 2048 }
  0x27   :  { %p3059_p2 = scmp.ne.s32.totalorder %s3797_s0, %s3058_s14  ;;  %p3062_p3 = scmp.lt.u32.totalorder %s3058_s14, %s3797_s0 }
  0x29   :  { %p3064_p4 = pnand %p3062_p3, %p3059_p2 }
  0x2b   :  { %3067 = shalt.err (!%p3064_p4)
}
  0x2c   :  { %s3068_s23 = scalar_lea.vmem %s23_s22, 2048  ;;  %p3073_p6 = scmp.lt.s32.totalorder %s23_s22, %s23_s22 }
  0x2d   :  { %p3069_p5 = scmp.ne.s32.totalorder %s23_s22, %s3068_s23  ;;  %p3074_p7 = scmp.lt.s32.totalorder %s3068_s23, %s3068_s23 }
  0x2f   :  { %p3075_p8 = por %p3074_p7, %p3073_p6 }
  0x31   :  { %p3076_p9 = pnand %p3075_p8, %p3069_p5 }
  0x33   :  { %3079 = shalt.err (!%p3076_p9)
}
  0x34   :  { %28 = dma.hbm_to_vmem [thread:$0]  %s3797_s0, 2048, %s23_s22, [#allocation3], %s3159_s28, %s3159_s28, %s3160_s9  }
  0x35   :  { %s3161_s24 = smov [#allocation7]   ;;  %s3162_s26 = smov [#allocation10]  }
  0x36   :  { %s46_s25 = sshll.u32 %s3161_s24, 4  ;;  %s74_s27 = sshll.u32 %s3162_s26, 4  ;;  %s47_s25 = int_to_ptr.vmem [resolvable:$true] %s46_s25  ;;  %s75_s27 = int_to_ptr.vmem [resolvable:$true] %s74_s27 }
  0x37   :  { %s3080_s1 = scalar_lea.hbm %s3799_s2, 1024 }
  0x38   :  { %p3081_p10 = scmp.ne.s32.totalorder %s3799_s2, %s3080_s1  ;;  %p3084_p11 = scmp.lt.u32.totalorder %s3080_s1, %s3799_s2 }
  0x3a   :  { %p3086_p12 = pnand %p3084_p11, %p3081_p10 }
  0x3c   :  { %3089 = shalt.err (!%p3086_p12)
}
  0x3d   :  { %s3090_s0 = scalar_lea.vmem %s47_s25, 1024  ;;  %p3095_p0 = scmp.lt.s32.totalorder %s47_s25, %s47_s25 }
  0x3e   :  { %p3091_p13 = scmp.ne.s32.totalorder %s47_s25, %s3090_s0  ;;  %p3096_p1 = scmp.lt.s32.totalorder %s3090_s0, %s3090_s0 }
  0x40   :  { %p3097_p2 = por %p3096_p1, %p3095_p0 }
  0x42   :  { %p3098_p3 = pnand %p3097_p2, %p3091_p13 }
  0x44   :  { %3101 = shalt.err (!%p3098_p3)
}
  0x45   :  { %52 = dma.hbm_to_vmem [thread:$0]  %s3799_s2, 1024, %s47_s25, [#allocation6], %s3159_s28, %s3159_s28, %s3160_s9  }
  0x46   :  { %s3102_s19 = scalar_lea.hbm %s3803_s6, 1024 }
  0x47   :  { %p3103_p4 = scmp.ne.s32.totalorder %s3803_s6, %s3102_s19  ;;  %p3106_p5 = scmp.lt.u32.totalorder %s3102_s19, %s3803_s6 }
  0x49   :  { %p3108_p6 = pnand %p3106_p5, %p3103_p4 }
  0x4b   :  { %3111 = shalt.err (!%p3108_p6)
}
  0x4c   :  { %s3112_s24 = scalar_lea.vmem %s75_s27, 1024  ;;  %p3117_p8 = scmp.lt.s32.totalorder %s75_s27, %s75_s27 }
  0x4d   :  { %p3113_p7 = scmp.ne.s32.totalorder %s75_s27, %s3112_s24  ;;  %p3118_p9 = scmp.lt.s32.totalorder %s3112_s24, %s3112_s24 }
  0x4f   :  { %p3119_p10 = por %p3118_p9, %p3117_p8 }
  0x51   :  { %p3120_p11 = pnand %p3119_p10, %p3113_p7 }
  0x53   :  { %3123 = shalt.err (!%p3120_p11)
}
  0x54   :  { %80 = dma.hbm_to_vmem [thread:$0]  %s3803_s6, 1024, %s75_s27, [#allocation9], %s3159_s28, %s3159_s28, %s3160_s9  }
  0x55   :  { %3146 = dma.done.wait [#allocation3], 2048  }
  0x56   :  { %3147 = vsyncadd [#allocation3], 4294965248 }
  0x57   :  { %3148 = dma.done.wait [#allocation6], 5120  }
  0x58   :  { %3149 = vsyncadd [#allocation6], 4294962176 }
  0x59   :  { %3150 = dma.done.wait [#allocation9], 2048  }
  0x5a   :  { %3151 = vsyncadd [#allocation9], 4294965248  ;;  %v2766_v0 = vld [vmem:[#allocation7] sm:$0xff]   ;;  %v2767_v1 = vld [vmem:[#allocation7 + $0x8] sm:$0xff]  }
  0x5b   :  { %2596 = vmatprep.subr.bf16.mxu0 %v2766_v0  ;;  %v2768_v2 = vld [vmem:[#allocation7 + $0x10] sm:$0xff]   ;;  %v2769_v3 = vld [vmem:[#allocation7 + $0x18] sm:$0xff]   ;;  %v2774_v4 = vld [vmem:[#allocation2] sm:$0xff]  }
  0x5c   :  { %2597 = vmatpush3.bf16.msra.mxu0 %v2766_v0  ;;  %2612 = vmatprep.mubr.bf16.mxu0 %v2774_v4  ;;  %v2770_v5 = vld [vmem:[#allocation7 + $0x20] sm:$0xff]   ;;  %v2771_v6 = vld [vmem:[#allocation7 + $0x28] sm:$0xff]   ;;  %v2772_v7 = vld [vmem:[#allocation7 + $0x30] sm:$0xff]  }
  0x5d   :  { %2598 = vmatprep.subr.bf16.mxu0 %v2767_v1  ;;  %v2773_v8 = vld [vmem:[#allocation7 + $0x38] sm:$0xff]   ;;  %v2775_v9 = vld [vmem:[#allocation2 + $0x8] sm:$0xff]   ;;  %v2776_v10 = vld [vmem:[#allocation2 + $0x10] sm:$0xff]  }
  0x5e   :  { %v2777_v11 = vld [vmem:[#allocation2 + $0x18] sm:$0xff]   ;;  %v2778_v12 = vld [vmem:[#allocation2 + $0x20] sm:$0xff]   ;;  %v2779_v13 = vld [vmem:[#allocation2 + $0x28] sm:$0xff]  }
  0x5f   :  { %v2780_v14 = vld [vmem:[#allocation2 + $0x30] sm:$0xff]   ;;  %v2781_v15 = vld [vmem:[#allocation2 + $0x38] sm:$0xff]   ;;  %v2782_v16 = vld [vmem:[#allocation2 + $0x40] sm:$0xff]  }
  0x60   :  { %2599 = vmatpush3.bf16.msra.mxu0 %v2767_v1  ;;  %v2783_v17 = vld [vmem:[#allocation2 + $0x48] sm:$0xff]   ;;  %v2784_v18 = vld [vmem:[#allocation2 + $0x50] sm:$0xff]   ;;  %v2785_v19 = vld [vmem:[#allocation2 + $0x58] sm:$0xff]  }
  0x61   :  { %2600 = vmatprep.subr.bf16.mxu0 %v2768_v2  ;;  %v2786_v20 = vld [vmem:[#allocation2 + $0x60] sm:$0xff]   ;;  %v2787_v21 = vld [vmem:[#allocation2 + $0x68] sm:$0xff]   ;;  %v2788_v22 = vld [vmem:[#allocation2 + $0x70] sm:$0xff]  }
  0x62   :  { %v2789_v23 = vld [vmem:[#allocation2 + $0x78] sm:$0xff]   ;;  %v3284_v24 = vld [vmem:[#allocation5 + $0x4] ss:$8 sps:$4 sm:$0xff]  }
  0x63   :  { %v3286_v25 = vld [vmem:[#allocation5 + $0x44] ss:$8 sps:$4 sm:$0xff]  }
  0x64   :  { %2601 = vmatpush3.bf16.msra.mxu0 %v2768_v2  ;;  %731 = vmatprep.mubr.bf16.mxu1 %v3286_v25 }
  0x65   :  { %2602 = vmatprep.subr.bf16.mxu0 %v2769_v3 }
  0x68   :  { %2603 = vmatpush3.bf16.msra.mxu0 %v2769_v3 }
  0x69   :  { %2604 = vmatprep.subr.bf16.mxu0 %v2770_v5 }
  0x6c   :  { %2605 = vmatpush3.bf16.msra.mxu0 %v2770_v5 }
  0x6d   :  { %2606 = vmatprep.subr.bf16.mxu0 %v2771_v6 }
  0x70   :  { %2607 = vmatpush3.bf16.msra.mxu0 %v2771_v6 }
  0x71   :  { %2608 = vmatprep.subr.bf16.mxu0 %v2772_v7 }
  0x74   :  { %2609 = vmatpush3.bf16.msra.mxu0 %v2772_v7 }
  0x75   :  { %2610 = vmatprep.subr.bf16.mxu0 %v2773_v8 }
  0x78   :  { %2611 = vmatpush3.bf16.msra.mxu0 %v2773_v8 }
  0x7b   :  { %2613 = vmatmul.mubr.bf16.vlgmr.msra.gmra.mrb[0].mxu0 %v2775_v9 }
  0x7c   :  { %2616 = vmatprep.mubr.bf16.mxu0 %v2776_v10  ;;  %v2838_v10 = vld [vmem:[#allocation8] sm:$0xff]  }
  0x83   :  { %2617 = vmatmul.mubr.bf16.gmra.mrb[4].mxu0 %v2777_v11  ;;  %v3290_v11 = vld [vmem:[#allocation5] ss:$8 sps:$4 sm:$0xff]  }
  0x84   :  { %2620 = vmatprep.mubr.bf16.mxu0 %v2778_v12  ;;  %v3292_v12 = vld [vmem:[#allocation5 + $0x40] ss:$8 sps:$4 sm:$0xff]  }
  0x8b   :  { %2621 = vmatmul.mubr.bf16.gmra.mrb[8].mxu0 %v2779_v13  ;;  %v3294_v13 = vld [vmem:[#allocation5 + $0x14] ss:$8 sps:$4 sm:$0xff]  }
  0x8c   :  { %2624 = vmatprep.mubr.bf16.mxu0 %v2780_v14  ;;  %v3296_v14 = vld [vmem:[#allocation5 + $0x54] ss:$8 sps:$4 sm:$0xff]  }
  0x93   :  { %2625 = vmatmul.mubr.bf16.gmra.mrb[12].mxu0 %v2781_v15  ;;  %v2839_v15 = vld [vmem:[#allocation8 + $0x8] sm:$0xff]  }
  0x94   :  { %2628 = vmatprep.mubr.bf16.mxu0 %v2782_v16  ;;  %v2840_v16 = vld [vmem:[#allocation8 + $0x10] sm:$0xff]  }
  0x9b   :  { %2629 = vmatmul.mubr.bf16.gmra.mrb[16].mxu0 %v2783_v17  ;;  %v3302_v17 = vld [vmem:[#allocation5 + $0x10] ss:$8 sps:$4 sm:$0xff]  }
  0x9c   :  { %2632 = vmatprep.mubr.bf16.mxu0 %v2784_v18  ;;  %v3304_v18 = vld [vmem:[#allocation5 + $0x50] ss:$8 sps:$4 sm:$0xff]  }
  0xa3   :  { %2633 = vmatmul.mubr.bf16.gmra.mrb[20].mxu0 %v2785_v19  ;;  %v3306_v19 = vld [vmem:[#allocation5 + $0x24] ss:$8 sps:$4 sm:$0xff]  }
  0xa4   :  { %2636 = vmatprep.mubr.bf16.mxu0 %v2786_v20  ;;  %v3308_v20 = vld [vmem:[#allocation5 + $0x64] ss:$8 sps:$4 sm:$0xff]  }
  0xab   :  { %2637 = vmatmul.mubr.bf16.gmra.mrb[24].mxu0 %v2787_v21  ;;  %v3314_v21 = vld [vmem:[#allocation5 + $0x20] ss:$8 sps:$4 sm:$0xff]  }
  0xac   :  { %2640 = vmatprep.mubr.bf16.mxu0 %v2788_v22  ;;  %v3316_v22 = vld [vmem:[#allocation5 + $0x60] ss:$8 sps:$4 sm:$0xff]  }
  0xb3   :  { %2641 = vmatmul.mubr.bf16.gmra.mrb[28].mxu0 %v2789_v23  ;;  %v3318_v23 = vld [vmem:[#allocation5 + $0x34] ss:$8 sps:$4 sm:$0xff]  }
  0xb4   :  { %699 = vmatprep.mubr.bf16.mxu0 %v3284_v24 }
 0x14e   :  { %v2614_v26 = vpop.f32.mrb[0].mxu0 }
 0x14f   :  { %v325_v27 = vpop.f32.mrb[1].mxu0 }
 0x150   :  { %v2615_v28 = vpop.f32.mrb[2].mxu0 }
 0x151   :  { %v485_v29 = vpack.c.bf16 %v2615_v28, %v2614_v26  ;;  %v328_v30 = vpop.f32.mrb[3].mxu0  ;;  %v3320_v26 = vld [vmem:[#allocation5 + $0x74] ss:$8 sps:$4 sm:$0xff]   ;;  %v3328_v28 = vld [vmem:[#allocation5 + $0x70] ss:$8 sps:$4 sm:$0xff]  }
 0x152   :  { %v484_v31 = vpack.c.bf16 %v328_v30, %v325_v27  ;;  %v3326_v27 = vld [vmem:[#allocation5 + $0x30] ss:$8 sps:$4 sm:$0xff]   ;;  %v3335_v30 = vld [vmem:[#allocation5 + $0x80] ss:$8 sps:$4 sm:$0xff]  }
 0x156   :  { %v2618_v32 = vpop.f32.mrb[4].mxu0 }
 0x157   :  { %v341_v33 = vpop.f32.mrb[5].mxu0 }
 0x158   :  { %v2619_v34 = vpop.f32.mrb[6].mxu0 }
 0x159   :  { %v487_v35 = vpack.c.bf16 %v2619_v34, %v2618_v32  ;;  %v344_v36 = vpop.f32.mrb[7].mxu0  ;;  %v3341_v32 = vld [vmem:[#allocation5 + $0x90] ss:$8 sps:$4 sm:$0xff]   ;;  %v3347_v34 = vld [vmem:[#allocation5 + $0xa0] ss:$8 sps:$4 sm:$0xff]  }
 0x15a   :  { %v486_v37 = vpack.c.bf16 %v344_v36, %v341_v33  ;;  %v3343_v33 = vld [vmem:[#allocation5 + $0xa4] ss:$8 sps:$4 sm:$0xff]   ;;  %v3353_v36 = vld [vmem:[#allocation5 + $0xb0] ss:$8 sps:$4 sm:$0xff]  }
 0x15e   :  { %v2622_v38 = vpop.f32.mrb[8].mxu0 }
 0x15f   :  { %v357_v39 = vpop.f32.mrb[9].mxu0 }
 0x160   :  { %v2623_v40 = vpop.f32.mrb[10].mxu0 }
 0x161   :  { %v489_v41 = vpack.c.bf16 %v2623_v40, %v2622_v38  ;;  %v360_v42 = vpop.f32.mrb[11].mxu0  ;;  %v3359_v38 = vld [vmem:[#allocation5 + $0xc0] ss:$8 sps:$4 sm:$0xff]   ;;  %v3365_v40 = vld [vmem:[#allocation5 + $0xd0] ss:$8 sps:$4 sm:$0xff]  }
 0x162   :  { %v488_v43 = vpack.c.bf16 %v360_v42, %v357_v39  ;;  %v3361_v39 = vld [vmem:[#allocation5 + $0xd4] ss:$8 sps:$4 sm:$0xff]   ;;  %v3371_v42 = vld [vmem:[#allocation5 + $0xe0] ss:$8 sps:$4 sm:$0xff]  }
 0x166   :  { %v2626_v44 = vpop.f32.mrb[12].mxu0 }
 0x167   :  { %v373_v45 = vpop.f32.mrb[13].mxu0 }
 0x168   :  { %v2627_v46 = vpop.f32.mrb[14].mxu0 }
 0x169   :  { %v491_v47 = vpack.c.bf16 %v2627_v46, %v2626_v44  ;;  %v376_v48 = vpop.f32.mrb[15].mxu0  ;;  %v2841_v44 = vld [vmem:[#allocation8 + $0x18] sm:$0xff]   ;;  %v2842_v46 = vld [vmem:[#allocation8 + $0x20] sm:$0xff]  }
 0x16a   :  { %v490_v49 = vpack.c.bf16 %v376_v48, %v373_v45  ;;  %v3377_v45 = vld [vmem:[#allocation5 + $0xf0] ss:$8 sps:$4 sm:$0xff]  }
 0x16b   :  { %v2844_v48 = vld [vmem:[#allocation8 + $0x30] sm:$0xff]  }
 0x16e   :  { %v2630_v50 = vpop.f32.mrb[16].mxu0 }
 0x16f   :  { %v389_v51 = vpop.f32.mrb[17].mxu0 }
 0x170   :  { %v2631_v52 = vpop.f32.mrb[18].mxu0 }
 0x171   :  { %v493_v53 = vpack.c.bf16 %v2631_v52, %v2630_v50  ;;  %v392_v54 = vpop.f32.mrb[19].mxu0  ;;  %v3383_v52 = vld [vmem:[%s3800_s3] ss:$0 sm:$0xff] }
 0x172   :  { %v492_v55 = vpack.c.bf16 %v392_v54, %v389_v51 }
 0x174   :  { %2212 = vmatprep.subr.bf16.mxu0 %v492_v55  ;;  %2740 = vmatprep.subr.bf16.mxu1 %v492_v55 }
 0x175   :  { %2213 = vmatpush3.bf16.msra.mxu0 %v484_v31  ;;  %2748 = vmatpush3.bf16.msra.mxu1 %v484_v31  ;;  %v3337_v31 = vld [vmem:[#allocation5 + $0x94] ss:$8 sps:$4 sm:$0xff]  }
 0x176   :  { %v2634_v56 = vpop.f32.mrb[20].mxu0  ;;  %2214 = vmatprep.subr.bf16.mxu0 %v493_v53  ;;  %2741 = vmatprep.subr.bf16.mxu1 %v493_v53 }
 0x177   :  { %v405_v57 = vpop.f32.mrb[21].mxu0 }
 0x178   :  { %v2635_v58 = vpop.f32.mrb[22].mxu0 }
 0x179   :  { %v495_v59 = vpack.c.bf16 %v2635_v58, %v2634_v56  ;;  %v408_v60 = vpop.f32.mrb[23].mxu0  ;;  %2215 = vmatpush3.bf16.msra.mxu0 %v485_v29  ;;  %2749 = vmatpush3.bf16.msra.mxu1 %v485_v29  ;;  %v3330_v29 = vld [vmem:[#allocation5 + $0x84] ss:$8 sps:$4 sm:$0xff]  }
 0x17a   :  { %v494_v61 = vpack.c.bf16 %v408_v60, %v405_v57 }
 0x17c   :  { %2216 = vmatprep.subr.bf16.mxu0 %v494_v61  ;;  %2742 = vmatprep.subr.bf16.mxu1 %v494_v61 }
 0x17d   :  { %2217 = vmatpush3.bf16.msra.mxu0 %v486_v37  ;;  %2750 = vmatpush3.bf16.msra.mxu1 %v486_v37  ;;  %v3355_v37 = vld [vmem:[#allocation5 + $0xc4] ss:$8 sps:$4 sm:$0xff]  }
 0x17e   :  { %v2638_v62 = vpop.f32.mrb[24].mxu0  ;;  %2218 = vmatprep.subr.bf16.mxu0 %v495_v59  ;;  %2743 = vmatprep.subr.bf16.mxu1 %v495_v59 }
 0x17f   :  { %v421_v63 = vpop.f32.mrb[25].mxu0 }
 0x180   :  { %v2639_v0 = vpop.f32.mrb[26].mxu0 }
 0x181   :  { %v497_v1 = vpack.c.bf16 %v2639_v0, %v2638_v62  ;;  %v424_v2 = vpop.f32.mrb[27].mxu0  ;;  %2219 = vmatpush3.bf16.msra.mxu0 %v487_v35  ;;  %2751 = vmatpush3.bf16.msra.mxu1 %v487_v35  ;;  %v3349_v35 = vld [vmem:[#allocation5 + $0xb4] ss:$8 sps:$4 sm:$0xff]  }
 0x182   :  { %v496_v3 = vpack.c.bf16 %v424_v2, %v421_v63 }
 0x184   :  { %2220 = vmatprep.subr.bf16.mxu0 %v496_v3  ;;  %2744 = vmatprep.subr.bf16.mxu1 %v496_v3 }
 0x185   :  { %2221 = vmatpush3.bf16.msra.mxu0 %v488_v43  ;;  %2752 = vmatpush3.bf16.msra.mxu1 %v488_v43  ;;  %v3373_v43 = vld [vmem:[#allocation5 + $0xf4] ss:$8 sps:$4 sm:$0xff]  }
 0x186   :  { %v2642_v4 = vpop.f32.mrb[28].mxu0  ;;  %2222 = vmatprep.subr.bf16.mxu0 %v497_v1  ;;  %2745 = vmatprep.subr.bf16.mxu1 %v497_v1 }
 0x187   :  { %v437_v5 = vpop.f32.mrb[29].mxu0 }
 0x188   :  { %v2643_v6 = vpop.f32.mrb[30].mxu0 }
 0x189   :  { %v499_v7 = vpack.c.bf16 %v2643_v6, %v2642_v4  ;;  %v440_v8 = vpop.f32.mrb[31].mxu0  ;;  %2223 = vmatpush3.bf16.msra.mxu0 %v489_v41  ;;  %2753 = vmatpush3.bf16.msra.mxu1 %v489_v41  ;;  %v3367_v41 = vld [vmem:[#allocation5 + $0xe4] ss:$8 sps:$4 sm:$0xff]  }
 0x18a   :  { %v498_v9 = vpack.c.bf16 %v440_v8, %v437_v5 }
 0x18c   :  { %2224 = vmatprep.subr.bf16.mxu0 %v498_v9  ;;  %2746 = vmatprep.subr.bf16.mxu1 %v498_v9 }
 0x18d   :  { %2225 = vmatpush3.bf16.msra.mxu0 %v490_v49  ;;  %2754 = vmatpush3.bf16.msra.mxu1 %v490_v49  ;;  %v2845_v49 = vld [vmem:[#allocation8 + $0x38] sm:$0xff]  }
 0x18e   :  { %2226 = vmatprep.subr.bf16.mxu0 %v499_v7  ;;  %2747 = vmatprep.subr.bf16.mxu1 %v499_v7 }
 0x191   :  { %2227 = vmatpush3.bf16.msra.mxu0 %v491_v47  ;;  %2755 = vmatpush3.bf16.msra.mxu1 %v491_v47  ;;  %v2843_v47 = vld [vmem:[#allocation8 + $0x28] sm:$0xff]  }
 0x192   :  { %2644 = vmatprep.subr.bf16.mxu0 %v2838_v10 }
 0x194   :  { %700 = vmatmul.mubr.bf16.vlgmr.msra.gmra.mrb[32].mxu0 %v3290_v11  ;;  %732 = vmatmul.mubr.bf16.vlgmr.msra.gmra.mrb[0].mxu1 %v3292_v12 }
 0x195   :  { %707 = vmatprep.mubr.bf16.mxu0 %v3294_v13  ;;  %739 = vmatprep.mubr.bf16.mxu1 %v3296_v14 }
 0x196   :  { %2645 = vmatpush3.bf16.msra.mxu0 %v2838_v10 }
 0x197   :  { %2646 = vmatprep.subr.bf16.mxu0 %v2839_v15 }
 0x19a   :  { %2647 = vmatpush3.bf16.msra.mxu0 %v2839_v15 }
 0x19b   :  { %2648 = vmatprep.subr.bf16.mxu0 %v2840_v16 }
 0x19c   :  { %708 = vmatmul.mubr.bf16.gmra.mrb[36].mxu0 %v3302_v17  ;;  %740 = vmatmul.mubr.bf16.gmra.mrb[4].mxu1 %v3304_v18 }
 0x19d   :  { %715 = vmatprep.mubr.bf16.mxu0 %v3306_v19  ;;  %747 = vmatprep.mubr.bf16.mxu1 %v3308_v20 }
 0x19e   :  { %2649 = vmatpush3.bf16.msra.mxu0 %v2840_v16 }
 0x19f   :  { %2650 = vmatprep.subr.bf16.mxu0 %v2841_v44 }
 0x1a2   :  { %2651 = vmatpush3.bf16.msra.mxu0 %v2841_v44 }
 0x1a3   :  { %2652 = vmatprep.subr.bf16.mxu0 %v2842_v46 }
 0x1a4   :  { %716 = vmatmul.mubr.bf16.gmra.mrb[40].mxu0 %v3314_v21  ;;  %748 = vmatmul.mubr.bf16.gmra.mrb[8].mxu1 %v3316_v22 }
 0x1a5   :  { %723 = vmatprep.mubr.bf16.mxu0 %v3318_v23  ;;  %755 = vmatprep.mubr.bf16.mxu1 %v3320_v26 }
 0x1a6   :  { %2653 = vmatpush3.bf16.msra.mxu0 %v2842_v46 }
 0x1a7   :  { %2654 = vmatprep.subr.bf16.mxu0 %v2843_v47 }
 0x1aa   :  { %2655 = vmatpush3.bf16.msra.mxu0 %v2843_v47 }
 0x1ab   :  { %2656 = vmatprep.subr.bf16.mxu0 %v2844_v48 }
 0x1ac   :  { %724 = vmatmul.mubr.bf16.gmra.mrb[44].mxu0 %v3326_v27  ;;  %756 = vmatmul.mubr.bf16.gmra.mrb[12].mxu1 %v3328_v28 }
 0x1ad   :  { %763 = vmatprep.mubr.bf16.mxu1 %v3330_v29 }
 0x1ae   :  { %2657 = vmatpush3.bf16.msra.mxu0 %v2844_v48 }
 0x1af   :  { %2658 = vmatprep.subr.bf16.mxu0 %v2845_v49 }
 0x1b2   :  { %2659 = vmatpush3.bf16.msra.mxu0 %v2845_v49 }
 0x1b4   :  { %764 = vmatmul.mubr.bf16.gmra.mrb[16].mxu1 %v3335_v30 }
 0x1b5   :  { %771 = vmatprep.mubr.bf16.mxu1 %v3337_v31 }
 0x1bc   :  { %772 = vmatmul.mubr.bf16.gmra.mrb[20].mxu1 %v3341_v32 }
 0x1bd   :  { %779 = vmatprep.mubr.bf16.mxu1 %v3343_v33 }
 0x1c4   :  { %780 = vmatmul.mubr.bf16.gmra.mrb[24].mxu1 %v3347_v34 }
 0x1c5   :  { %787 = vmatprep.mubr.bf16.mxu1 %v3349_v35 }
 0x1cc   :  { %788 = vmatmul.mubr.bf16.gmra.mrb[28].mxu1 %v3353_v36 }
 0x1cd   :  { %795 = vmatprep.mubr.bf16.mxu1 %v3355_v37 }
 0x1d4   :  { %796 = vmatmul.mubr.bf16.gmra.mrb[32].mxu1 %v3359_v38 }
 0x1d5   :  { %803 = vmatprep.mubr.bf16.mxu1 %v3361_v39 }
 0x1dc   :  { %804 = vmatmul.mubr.bf16.gmra.mrb[36].mxu1 %v3365_v40 }
 0x1dd   :  { %811 = vmatprep.mubr.bf16.mxu1 %v3367_v41 }
 0x1e4   :  { %812 = vmatmul.mubr.bf16.gmra.mrb[40].mxu1 %v3371_v42 }
 0x1e5   :  { %819 = vmatprep.mubr.bf16.mxu1 %v3373_v43 }
 0x1ec   :  { %820 = vmatmul.mubr.bf16.gmra.mrb[44].mxu1 %v3377_v45 }
 0x267   :  { %v2228_v50 = vpop.f32.mrb[32].mxu0  ;;  %v2252_v51 = vpop.f32.mrb[0].mxu1 }
 0x268   :  { %v2229_v53 = vpop.f32.mrb[33].mxu0  ;;  %v2253_v54 = vpop.f32.mrb[1].mxu1 }
 0x269   :  { %v2230_v55 = vadd.f32 %v2229_v53, %v2228_v50  ;;  %v2231_v56 = vpop.f32.mrb[34].mxu0  ;;  %v2254_v57 = vadd.f32 %v2253_v54, %v2252_v51  ;;  %v2255_v58 = vpop.f32.mrb[2].mxu1 }
 0x26a   :  { %v2232_v59 = vpop.f32.mrb[35].mxu0  ;;  %v2256_v60 = vpop.f32.mrb[3].mxu1 }
 0x26b   :  { %v702_v61 = vadd.f32 %v2230_v55, %v3383_v52  ;;  %v2233_v62 = vadd.f32 %v2232_v59, %v2231_v56  ;;  %v734_v63 = vadd.f32 %v2254_v57, %v3383_v52  ;;  %v2257_v0 = vadd.f32 %v2256_v60, %v2255_v58 }
 0x26d   :  { %v828_v1 = vmax.f32 %v702_v61, 0.0  ;;  %v705_v2 = vadd.f32 %v2233_v62, %v3383_v52  ;;  %v737_v3 = vadd.f32 %v2257_v0, %v3383_v52  ;;  %v836_v5 = vmax.f32 %v734_v63, 0.0 }
 0x26f   :  { %v829_v4 = vmax.f32 %v705_v2, 0.0  ;;  %v2234_v6 = vpop.f32.mrb[36].mxu0  ;;  %v837_v7 = vmax.f32 %v737_v3, 0.0  ;;  %v2258_v8 = vpop.f32.mrb[4].mxu1 }
 0x270   :  { %v2235_v9 = vpop.f32.mrb[37].mxu0  ;;  %v2259_v10 = vpop.f32.mrb[5].mxu1 }
 0x271   :  { %v2236_v15 = vadd.f32 %v2235_v9, %v2234_v6  ;;  %v2237_v16 = vpop.f32.mrb[38].mxu0  ;;  %v860_v44 = vpack.c.bf16 %v829_v4, %v828_v1  ;;  %v2260_v46 = vadd.f32 %v2259_v10, %v2258_v8  ;;  %v2261_v47 = vpop.f32.mrb[6].mxu1  ;;  %v3389_v48 = vpack.c.bf16 %v837_v7, %v836_v5 }
 0x272   :  { %v2238_v49 = vpop.f32.mrb[39].mxu0  ;;  %v2262_v50 = vpop.f32.mrb[7].mxu1 }
 0x273   :  { %v710_v51 = vadd.f32 %v2236_v15, %v3383_v52  ;;  %v2239_v53 = vadd.f32 %v2238_v49, %v2237_v16  ;;  %2660 = vmatprep.mubr.bf16.mxu0 %v860_v44  ;;  %v742_v54 = vadd.f32 %v2260_v46, %v3383_v52  ;;  %v2263_v55 = vadd.f32 %v2262_v50, %v2261_v47 }
 0x275   :  { %v830_v56 = vmax.f32 %v710_v51, 0.0  ;;  %v713_v57 = vadd.f32 %v2239_v53, %v3383_v52  ;;  %v745_v58 = vadd.f32 %v2263_v55, %v3383_v52  ;;  %v838_v60 = vmax.f32 %v742_v54, 0.0 }
 0x277   :  { %v831_v59 = vmax.f32 %v713_v57, 0.0  ;;  %v2240_v61 = vpop.f32.mrb[40].mxu0  ;;  %v839_v62 = vmax.f32 %v745_v58, 0.0  ;;  %v2264_v63 = vpop.f32.mrb[8].mxu1 }
 0x278   :  { %v2241_v0 = vpop.f32.mrb[41].mxu0  ;;  %v2265_v1 = vpop.f32.mrb[9].mxu1 }
 0x279   :  { %v861_v2 = vpack.c.bf16 %v831_v59, %v830_v56  ;;  %v2242_v3 = vadd.f32 %v2241_v0, %v2240_v61  ;;  %v2243_v4 = vpop.f32.mrb[42].mxu0  ;;  %v2266_v5 = vadd.f32 %v2265_v1, %v2264_v63  ;;  %v2267_v6 = vpop.f32.mrb[10].mxu1  ;;  %v865_v7 = vpack.c.bf16 %v839_v62, %v838_v60 }
 0x27a   :  { %v2244_v8 = vpop.f32.mrb[43].mxu0  ;;  %v2268_v9 = vpop.f32.mrb[11].mxu1 }
 0x27b   :  { %v718_v10 = vadd.f32 %v2242_v3, %v3383_v52  ;;  %v2245_v15 = vadd.f32 %v2244_v8, %v2243_v4  ;;  %2661 = vmatmul.mubr.bf16.vlgmr.msra.gmra.mrb[48].mxu0 %v861_v2  ;;  %v750_v16 = vadd.f32 %v2266_v5, %v3383_v52  ;;  %v2269_v44 = vadd.f32 %v2268_v9, %v2267_v6 }
 0x27d   :  { %v832_v46 = vmax.f32 %v718_v10, 0.0  ;;  %v721_v47 = vadd.f32 %v2245_v15, %v3383_v52  ;;  %v753_v49 = vadd.f32 %v2269_v44, %v3383_v52  ;;  %v840_v51 = vmax.f32 %v750_v16, 0.0 }
 0x27f   :  { %v833_v50 = vmax.f32 %v721_v47, 0.0  ;;  %v2246_v53 = vpop.f32.mrb[44].mxu0  ;;  %v841_v54 = vmax.f32 %v753_v49, 0.0  ;;  %v2270_v55 = vpop.f32.mrb[12].mxu1 }
 0x280   :  { %v2247_v56 = vpop.f32.mrb[45].mxu0  ;;  %v2271_v57 = vpop.f32.mrb[13].mxu1 }
 0x281   :  { %v2248_v58 = vadd.f32 %v2247_v56, %v2246_v53  ;;  %v2249_v59 = vpop.f32.mrb[46].mxu0  ;;  %v862_v60 = vpack.c.bf16 %v833_v50, %v832_v46  ;;  %v2272_v61 = vadd.f32 %v2271_v57, %v2270_v55  ;;  %v2273_v62 = vpop.f32.mrb[14].mxu1  ;;  %v866_v63 = vpack.c.bf16 %v841_v54, %v840_v51 }
 0x282   :  { %v2250_v0 = vpop.f32.mrb[47].mxu0  ;;  %v2274_v1 = vpop.f32.mrb[15].mxu1 }
 0x283   :  { %v726_v2 = vadd.f32 %v2248_v58, %v3383_v52  ;;  %v2251_v3 = vadd.f32 %v2250_v0, %v2249_v59  ;;  %2664 = vmatprep.mubr.bf16.mxu0 %v862_v60  ;;  %v758_v4 = vadd.f32 %v2272_v61, %v3383_v52  ;;  %v2275_v5 = vadd.f32 %v2274_v1, %v2273_v62 }
 0x285   :  { %v834_v6 = vmax.f32 %v726_v2, 0.0  ;;  %v729_v8 = vadd.f32 %v2251_v3, %v3383_v52  ;;  %v761_v9 = vadd.f32 %v2275_v5, %v3383_v52  ;;  %v842_v15 = vmax.f32 %v758_v4, 0.0 }
 0x287   :  { %v835_v10 = vmax.f32 %v729_v8, 0.0  ;;  %v843_v16 = vmax.f32 %v761_v9, 0.0  ;;  %v2276_v44 = vpop.f32.mrb[16].mxu1 }
 0x288   :  { %v2277_v46 = vpop.f32.mrb[17].mxu1 }
 0x289   :  { %v863_v47 = vpack.c.bf16 %v835_v10, %v834_v6  ;;  %v2278_v49 = vadd.f32 %v2277_v46, %v2276_v44  ;;  %v2279_v50 = vpop.f32.mrb[18].mxu1  ;;  %v867_v51 = vpack.c.bf16 %v843_v16, %v842_v15 }
 0x28a   :  { %v2280_v53 = vpop.f32.mrb[19].mxu1 }
 0x28b   :  { %2665 = vmatmul.mubr.bf16.gmra.mrb[52].mxu0 %v863_v47  ;;  %v766_v54 = vadd.f32 %v2278_v49, %v3383_v52  ;;  %v2281_v55 = vadd.f32 %v2280_v53, %v2279_v50 }
 0x28c   :  { %2668 = vmatprep.mubr.bf16.mxu0 %v3389_v48 }
 0x28d   :  { %v769_v56 = vadd.f32 %v2281_v55, %v3383_v52  ;;  %v844_v57 = vmax.f32 %v766_v54, 0.0 }
 0x28f   :  { %v845_v58 = vmax.f32 %v769_v56, 0.0  ;;  %v2282_v59 = vpop.f32.mrb[20].mxu1 }
 0x290   :  { %v2283_v60 = vpop.f32.mrb[21].mxu1 }
 0x291   :  { %v2284_v61 = vadd.f32 %v2283_v60, %v2282_v59  ;;  %v2285_v62 = vpop.f32.mrb[22].mxu1  ;;  %v868_v0 = vpack.c.bf16 %v845_v58, %v844_v57 }
 0x292   :  { %v2286_v1 = vpop.f32.mrb[23].mxu1 }
 0x293   :  { %2669 = vmatmul.mubr.bf16.gmra.mrb[56].mxu0 %v865_v7  ;;  %v774_v2 = vadd.f32 %v2284_v61, %v3383_v52  ;;  %v2287_v3 = vadd.f32 %v2286_v1, %v2285_v62 }
 0x294   :  { %2672 = vmatprep.mubr.bf16.mxu0 %v866_v63 }
 0x295   :  { %v777_v4 = vadd.f32 %v2287_v3, %v3383_v52  ;;  %v846_v5 = vmax.f32 %v774_v2, 0.0 }
 0x297   :  { %v847_v6 = vmax.f32 %v777_v4, 0.0  ;;  %v2288_v48 = vpop.f32.mrb[24].mxu1 }
 0x298   :  { %v2289_v8 = vpop.f32.mrb[25].mxu1 }
 0x299   :  { %v2290_v9 = vadd.f32 %v2289_v8, %v2288_v48  ;;  %v2291_v10 = vpop.f32.mrb[26].mxu1  ;;  %v869_v15 = vpack.c.bf16 %v847_v6, %v846_v5 }
 0x29a   :  { %v2292_v16 = vpop.f32.mrb[27].mxu1 }
 0x29b   :  { %2673 = vmatmul.mubr.bf16.gmra.mrb[60].mxu0 %v867_v51  ;;  %v782_v44 = vadd.f32 %v2290_v9, %v3383_v52  ;;  %v2293_v46 = vadd.f32 %v2292_v16, %v2291_v10 }
 0x29c   :  { %2676 = vmatprep.mubr.bf16.mxu0 %v868_v0 }
 0x29d   :  { %v785_v7 = vadd.f32 %v2293_v46, %v3383_v52  ;;  %v848_v47 = vmax.f32 %v782_v44, 0.0 }
 0x29f   :  { %v849_v49 = vmax.f32 %v785_v7, 0.0  ;;  %v2294_v63 = vpop.f32.mrb[28].mxu1 }
 0x2a0   :  { %v2295_v50 = vpop.f32.mrb[29].mxu1 }
 0x2a1   :  { %v2296_v53 = vadd.f32 %v2295_v50, %v2294_v63  ;;  %v2297_v54 = vpop.f32.mrb[30].mxu1  ;;  %v870_v55 = vpack.c.bf16 %v849_v49, %v848_v47 }
 0x2a2   :  { %v2298_v56 = vpop.f32.mrb[31].mxu1 }
 0x2a3   :  { %v790_v57 = vadd.f32 %v2296_v53, %v3383_v52  ;;  %v2299_v58 = vadd.f32 %v2298_v56, %v2297_v54  ;;  %2677 = vmatmul.mubr.bf16.gmra.mrb[64].mxu0 %v869_v15 }
 0x2a4   :  { %2680 = vmatprep.mubr.bf16.mxu0 %v870_v55 }
 0x2a5   :  { %v793_v51 = vadd.f32 %v2299_v58, %v3383_v52  ;;  %v850_v59 = vmax.f32 %v790_v57, 0.0 }
 0x2a7   :  { %v851_v60 = vmax.f32 %v793_v51, 0.0  ;;  %v2300_v61 = vpop.f32.mrb[32].mxu1 }
 0x2a8   :  { %v2301_v62 = vpop.f32.mrb[33].mxu1 }
 0x2a9   :  { %v871_v0 = vpack.c.bf16 %v851_v60, %v850_v59  ;;  %v2302_v1 = vadd.f32 %v2301_v62, %v2300_v61  ;;  %v2303_v2 = vpop.f32.mrb[34].mxu1 }
 0x2aa   :  { %v2304_v3 = vpop.f32.mrb[35].mxu1 }
 0x2ab   :  { %2681 = vmatmul.mubr.bf16.gmra.mrb[68].mxu0 %v871_v0  ;;  %v798_v4 = vadd.f32 %v2302_v1, %v3383_v52  ;;  %v2305_v5 = vadd.f32 %v2304_v3, %v2303_v2 }
 0x2ad   :  { %v801_v6 = vadd.f32 %v2305_v5, %v3383_v52  ;;  %v852_v48 = vmax.f32 %v798_v4, 0.0 }
 0x2af   :  { %v853_v8 = vmax.f32 %v801_v6, 0.0  ;;  %v2306_v9 = vpop.f32.mrb[36].mxu1 }
 0x2b0   :  { %v2307_v10 = vpop.f32.mrb[37].mxu1 }
 0x2b1   :  { %v2308_v15 = vadd.f32 %v2307_v10, %v2306_v9  ;;  %v2309_v16 = vpop.f32.mrb[38].mxu1  ;;  %v872_v44 = vpack.c.bf16 %v853_v8, %v852_v48 }
 0x2b2   :  { %v2310_v46 = vpop.f32.mrb[39].mxu1 }
 0x2b3   :  { %v806_v7 = vadd.f32 %v2308_v15, %v3383_v52  ;;  %v2311_v47 = vadd.f32 %v2310_v46, %v2309_v16  ;;  %2684 = vmatprep.mubr.bf16.mxu0 %v872_v44 }
 0x2b5   :  { %v809_v49 = vadd.f32 %v2311_v47, %v3383_v52  ;;  %v854_v63 = vmax.f32 %v806_v7, 0.0 }
 0x2b7   :  { %v855_v50 = vmax.f32 %v809_v49, 0.0  ;;  %v2312_v53 = vpop.f32.mrb[40].mxu1 }
 0x2b8   :  { %v2313_v54 = vpop.f32.mrb[41].mxu1 }
 0x2b9   :  { %v873_v55 = vpack.c.bf16 %v855_v50, %v854_v63  ;;  %v2314_v56 = vadd.f32 %v2313_v54, %v2312_v53  ;;  %v2315_v57 = vpop.f32.mrb[42].mxu1 }
 0x2ba   :  { %v2316_v58 = vpop.f32.mrb[43].mxu1 }
 0x2bb   :  { %2685 = vmatmul.mubr.bf16.gmra.mrb[72].mxu0 %v873_v55  ;;  %v814_v51 = vadd.f32 %v2314_v56, %v3383_v52  ;;  %v2317_v59 = vadd.f32 %v2316_v58, %v2315_v57 }
 0x2bd   :  { %v817_v60 = vadd.f32 %v2317_v59, %v3383_v52  ;;  %v856_v61 = vmax.f32 %v814_v51, 0.0 }
 0x2bf   :  { %v857_v62 = vmax.f32 %v817_v60, 0.0  ;;  %v2318_v0 = vpop.f32.mrb[44].mxu1 }
 0x2c0   :  { %v2319_v1 = vpop.f32.mrb[45].mxu1 }
 0x2c1   :  { %v2320_v2 = vadd.f32 %v2319_v1, %v2318_v0  ;;  %v2321_v3 = vpop.f32.mrb[46].mxu1  ;;  %v874_v4 = vpack.c.bf16 %v857_v62, %v856_v61 }
 0x2c2   :  { %v2322_v5 = vpop.f32.mrb[47].mxu1 }
 0x2c3   :  { %v822_v6 = vadd.f32 %v2320_v2, %v3383_v52  ;;  %v2323_v48 = vadd.f32 %v2322_v5, %v2321_v3  ;;  %2688 = vmatprep.mubr.bf16.mxu0 %v874_v4 }
 0x2c5   :  { %v825_v8 = vadd.f32 %v2323_v48, %v3383_v52  ;;  %v858_v9 = vmax.f32 %v822_v6, 0.0 }
 0x2c7   :  { %v859_v10 = vmax.f32 %v825_v8, 0.0 }
 0x2c9   :  { %v875_v15 = vpack.c.bf16 %v859_v10, %v858_v9 }
 0x2cb   :  { %2689 = vmatmul.mubr.bf16.gmra.mrb[76].mxu0 %v875_v15 }
 0x2cc   :  { %1156 = vmatprep.mubr.bf16.mxu0 %v3284_v24 }
 0x34e   :  { %v2662_v16 = vpop.f32.mrb[48].mxu0 }
 0x34f   :  { %v974_v44 = vpop.f32.mrb[49].mxu0 }
 0x350   :  { %v2663_v46 = vpop.f32.mrb[50].mxu0 }
 0x351   :  { %v1102_v7 = vpack.c.bf16 %v2663_v46, %v2662_v16  ;;  %v977_v47 = vpop.f32.mrb[51].mxu0 }
 0x352   :  { %v1101_v49 = vpack.c.bf16 %v977_v47, %v974_v44 }
 0x35e   :  { %v2666_v63 = vpop.f32.mrb[52].mxu0 }
 0x35f   :  { %v990_v50 = vpop.f32.mrb[53].mxu0 }
 0x360   :  { %v2667_v53 = vpop.f32.mrb[54].mxu0 }
 0x361   :  { %v1104_v54 = vpack.c.bf16 %v2667_v53, %v2666_v63  ;;  %v993_v55 = vpop.f32.mrb[55].mxu0 }
 0x362   :  { %v1103_v56 = vpack.c.bf16 %v993_v55, %v990_v50 }
 0x366   :  { %v2670_v57 = vpop.f32.mrb[56].mxu0 }
 0x367   :  { %v1006_v52 = vpop.f32.mrb[57].mxu0 }
 0x368   :  { %v2671_v58 = vpop.f32.mrb[58].mxu0 }
 0x369   :  { %v1106_v51 = vpack.c.bf16 %v2671_v58, %v2670_v57  ;;  %v1009_v59 = vpop.f32.mrb[59].mxu0 }
 0x36a   :  { %v1105_v60 = vpack.c.bf16 %v1009_v59, %v1006_v52 }
 0x36e   :  { %v2674_v61 = vpop.f32.mrb[60].mxu0 }
 0x36f   :  { %v1022_v24 = vpop.f32.mrb[61].mxu0 }
 0x370   :  { %v2675_v62 = vpop.f32.mrb[62].mxu0 }
 0x371   :  { %v1108_v0 = vpack.c.bf16 %v2675_v62, %v2674_v61  ;;  %v1025_v1 = vpop.f32.mrb[63].mxu0 }
 0x372   :  { %v1107_v2 = vpack.c.bf16 %v1025_v1, %v1022_v24  ;;  %v2847_v24 = vld [vmem:[#allocation10 + $0x8] sm:$0xff]  }
 0x376   :  { %v2678_v3 = vpop.f32.mrb[64].mxu0 }
 0x377   :  { %v1038_v4 = vpop.f32.mrb[65].mxu0 }
 0x378   :  { %v2679_v5 = vpop.f32.mrb[66].mxu0 }
 0x379   :  { %v1110_v6 = vpack.c.bf16 %v2679_v5, %v2678_v3  ;;  %v1041_v48 = vpop.f32.mrb[67].mxu0 }
 0x37a   :  { %v1109_v8 = vpack.c.bf16 %v1041_v48, %v1038_v4 }
 0x37c   :  { %2348 = vmatprep.subr.bf16.mxu0 %v1109_v8 }
 0x37d   :  { %2349 = vmatpush3.bf16.msra.mxu0 %v1101_v49 }
 0x37e   :  { %v2682_v9 = vpop.f32.mrb[68].mxu0  ;;  %2350 = vmatprep.subr.bf16.mxu0 %v1110_v6 }
 0x37f   :  { %v1054_v10 = vpop.f32.mrb[69].mxu0 }
 0x380   :  { %v2683_v15 = vpop.f32.mrb[70].mxu0 }
 0x381   :  { %v1112_v16 = vpack.c.bf16 %v2683_v15, %v2682_v9  ;;  %v1057_v44 = vpop.f32.mrb[71].mxu0  ;;  %2351 = vmatpush3.bf16.msra.mxu0 %v1102_v7 }
 0x382   :  { %v1111_v46 = vpack.c.bf16 %v1057_v44, %v1054_v10 }
 0x384   :  { %2352 = vmatprep.subr.bf16.mxu0 %v1111_v46 }
 0x385   :  { %2353 = vmatpush3.bf16.msra.mxu0 %v1103_v56  ;;  %v2846_v56 = vld [vmem:[#allocation10] sm:$0xff]  }
 0x386   :  { %2354 = vmatprep.subr.bf16.mxu0 %v1112_v16  ;;  %2692 = vmatprep.subr.bf16.mxu1 %v2846_v56 }
 0x387   :  { %2693 = vmatpush3.bf16.msra.mxu1 %v2846_v56 }
 0x388   :  { %2694 = vmatprep.subr.bf16.mxu1 %v2847_v24 }
 0x389   :  { %2355 = vmatpush3.bf16.msra.mxu0 %v1104_v54  ;;  %v2848_v54 = vld [vmem:[#allocation10 + $0x10] sm:$0xff]  }
 0x38b   :  { %2695 = vmatpush3.bf16.msra.mxu1 %v2847_v24 }
 0x38c   :  { %2696 = vmatprep.subr.bf16.mxu1 %v2848_v54 }
 0x38e   :  { %v2686_v47 = vpop.f32.mrb[72].mxu0 }
 0x38f   :  { %v1070_v63 = vpop.f32.mrb[73].mxu0  ;;  %2697 = vmatpush3.bf16.msra.mxu1 %v2848_v54 }
 0x390   :  { %v2687_v50 = vpop.f32.mrb[74].mxu0 }
 0x391   :  { %v1114_v53 = vpack.c.bf16 %v2687_v50, %v2686_v47  ;;  %v1073_v55 = vpop.f32.mrb[75].mxu0 }
 0x392   :  { %v1113_v57 = vpack.c.bf16 %v1073_v55, %v1070_v63 }
 0x394   :  { %2356 = vmatprep.subr.bf16.mxu0 %v1113_v57 }
 0x395   :  { %2357 = vmatpush3.bf16.msra.mxu0 %v1105_v60 }
 0x396   :  { %2358 = vmatprep.subr.bf16.mxu0 %v1114_v53 }
 0x399   :  { %2359 = vmatpush3.bf16.msra.mxu0 %v1106_v51  ;;  %v2849_v51 = vld [vmem:[#allocation10 + $0x18] sm:$0xff]  }
 0x39a   :  { %2698 = vmatprep.subr.bf16.mxu1 %v2849_v51 }
 0x39b   :  { %2699 = vmatpush3.bf16.msra.mxu1 %v2849_v51 }
 0x39e   :  { %v2690_v49 = vpop.f32.mrb[76].mxu0 }
 0x39f   :  { %v1086_v52 = vpop.f32.mrb[77].mxu0 }
 0x3a0   :  { %v2691_v58 = vpop.f32.mrb[78].mxu0 }
 0x3a1   :  { %v1116_v59 = vpack.c.bf16 %v2691_v58, %v2690_v49  ;;  %v1089_v7 = vpop.f32.mrb[79].mxu0 }
 0x3a2   :  { %v1115_v61 = vpack.c.bf16 %v1089_v7, %v1086_v52 }
 0x3a4   :  { %2360 = vmatprep.subr.bf16.mxu0 %v1115_v61 }
 0x3a5   :  { %2361 = vmatpush3.bf16.msra.mxu0 %v1107_v2 }
 0x3a6   :  { %2362 = vmatprep.subr.bf16.mxu0 %v1116_v59 }
 0x3a9   :  { %2363 = vmatpush3.bf16.msra.mxu0 %v1108_v0 }
 0x3ac   :  { %1157 = vmatmul.mubr.bf16.vlgmr.msra.gmra.mrb[80].mxu0 %v3290_v11  ;;  %v2851_v11 = vld [vmem:[#allocation10 + $0x28] sm:$0xff]  }
 0x3ad   :  { %1164 = vmatprep.mubr.bf16.mxu0 %v3294_v13  ;;  %v2853_v13 = vld [vmem:[#allocation10 + $0x38] sm:$0xff]  }
 0x3b4   :  { %1165 = vmatmul.mubr.bf16.gmra.mrb[84].mxu0 %v3302_v17  ;;  %v3455_v17 = vld [vmem:[%s3802_s5] ss:$0 sm:$0xff] }
 0x3b5   :  { %1172 = vmatprep.mubr.bf16.mxu0 %v3306_v19 }
 0x3bc   :  { %1173 = vmatmul.mubr.bf16.gmra.mrb[88].mxu0 %v3314_v21 }
 0x3bd   :  { %1180 = vmatprep.mubr.bf16.mxu0 %v3318_v23 }
 0x3c4   :  { %1181 = vmatmul.mubr.bf16.gmra.mrb[92].mxu0 %v3326_v27 }
 0x3c5   :  { %1188 = vmatprep.mubr.bf16.mxu0 %v3286_v25  ;;  %v2850_v25 = vld [vmem:[#allocation10 + $0x20] sm:$0xff]  }
 0x3c6   :  { %2700 = vmatprep.subr.bf16.mxu1 %v2850_v25 }
 0x3c7   :  { %2701 = vmatpush3.bf16.msra.mxu1 %v2850_v25 }
 0x3c8   :  { %2702 = vmatprep.subr.bf16.mxu1 %v2851_v11 }
 0x3cb   :  { %2703 = vmatpush3.bf16.msra.mxu1 %v2851_v11 }
 0x3cc   :  { %1189 = vmatmul.mubr.bf16.gmra.mrb[96].mxu0 %v3292_v12  ;;  %v2852_v12 = vld [vmem:[#allocation10 + $0x30] sm:$0xff]  }
 0x3cd   :  { %1196 = vmatprep.mubr.bf16.mxu0 %v3296_v14  ;;  %2704 = vmatprep.subr.bf16.mxu1 %v2852_v12 }
 0x3cf   :  { %2705 = vmatpush3.bf16.msra.mxu1 %v2852_v12 }
 0x3d0   :  { %2706 = vmatprep.subr.bf16.mxu1 %v2853_v13 }
 0x3d3   :  { %2707 = vmatpush3.bf16.msra.mxu1 %v2853_v13 }
 0x3d4   :  { %1197 = vmatmul.mubr.bf16.gmra.mrb[100].mxu0 %v3304_v18 }
 0x3d5   :  { %1204 = vmatprep.mubr.bf16.mxu0 %v3308_v20 }
 0x3dc   :  { %1205 = vmatmul.mubr.bf16.gmra.mrb[104].mxu0 %v3316_v22 }
 0x3dd   :  { %1212 = vmatprep.mubr.bf16.mxu0 %v3320_v26 }
 0x3e4   :  { %1213 = vmatmul.mubr.bf16.gmra.mrb[108].mxu0 %v3328_v28 }
 0x3e5   :  { %1220 = vmatprep.mubr.bf16.mxu0 %v3330_v29 }
 0x3ec   :  { %1221 = vmatmul.mubr.bf16.gmra.mrb[112].mxu0 %v3335_v30 }
 0x3ed   :  { %1228 = vmatprep.mubr.bf16.mxu0 %v3337_v31 }
 0x3f4   :  { %1229 = vmatmul.mubr.bf16.gmra.mrb[116].mxu0 %v3341_v32 }
 0x3f5   :  { %1236 = vmatprep.mubr.bf16.mxu0 %v3343_v33 }
 0x3fc   :  { %1237 = vmatmul.mubr.bf16.gmra.mrb[120].mxu0 %v3347_v34 }
 0x3fd   :  { %1244 = vmatprep.mubr.bf16.mxu0 %v3349_v35 }
 0x404   :  { %1245 = vmatmul.mubr.bf16.gmra.mrb[124].mxu0 %v3353_v36 }
 0x405   :  { %1252 = vmatprep.mubr.bf16.mxu0 %v3355_v37 }
 0x40c   :  { %1253 = vmatmul.mubr.bf16.gmra.mrb[128].mxu0 %v3359_v38 }
 0x40d   :  { %1260 = vmatprep.mubr.bf16.mxu0 %v3361_v39 }
 0x414   :  { %1261 = vmatmul.mubr.bf16.gmra.mrb[132].mxu0 %v3365_v40 }
 0x415   :  { %1268 = vmatprep.mubr.bf16.mxu0 %v3367_v41 }
 0x41c   :  { %1269 = vmatmul.mubr.bf16.gmra.mrb[136].mxu0 %v3371_v42 }
 0x41d   :  { %1276 = vmatprep.mubr.bf16.mxu0 %v3373_v43 }
 0x424   :  { %1277 = vmatmul.mubr.bf16.gmra.mrb[140].mxu0 %v3377_v45 }
 0x47f   :  { %v2364_v14 = vpop.f32.mrb[80].mxu0 }
 0x480   :  { %v2365_v18 = vpop.f32.mrb[81].mxu0 }
 0x481   :  { %v2366_v19 = vadd.f32 %v2365_v18, %v2364_v14  ;;  %v2367_v20 = vpop.f32.mrb[82].mxu0 }
 0x482   :  { %v2368_v21 = vpop.f32.mrb[83].mxu0 }
 0x483   :  { %v1159_v22 = vadd.f32 %v2366_v19, %v3455_v17  ;;  %v2369_v23 = vadd.f32 %v2368_v21, %v2367_v20 }
 0x485   :  { %v1162_v26 = vadd.f32 %v2369_v23, %v3455_v17  ;;  %v1285_v27 = vmax.f32 %v1159_v22, 0.0 }
 0x487   :  { %v1286_v28 = vmax.f32 %v1162_v26, 0.0  ;;  %v2370_v29 = vpop.f32.mrb[84].mxu0 }
 0x488   :  { %v2371_v30 = vpop.f32.mrb[85].mxu0 }
 0x489   :  { %v2372_v31 = vadd.f32 %v2371_v30, %v2370_v29  ;;  %v2373_v32 = vpop.f32.mrb[86].mxu0  ;;  %v1317_v33 = vpack.c.bf16 %v1286_v28, %v1285_v27 }
 0x48a   :  { %v2374_v34 = vpop.f32.mrb[87].mxu0 }
 0x48b   :  { %v1167_v35 = vadd.f32 %v2372_v31, %v3455_v17  ;;  %v2375_v36 = vadd.f32 %v2374_v34, %v2373_v32  ;;  %2708 = vmatprep.mubr.bf16.mxu1 %v1317_v33 }
 0x48d   :  { %v1170_v37 = vadd.f32 %v2375_v36, %v3455_v17  ;;  %v1287_v38 = vmax.f32 %v1167_v35, 0.0 }
 0x48f   :  { %v1288_v39 = vmax.f32 %v1170_v37, 0.0  ;;  %v2376_v40 = vpop.f32.mrb[88].mxu0 }
 0x490   :  { %v2377_v41 = vpop.f32.mrb[89].mxu0 }
 0x491   :  { %v1318_v42 = vpack.c.bf16 %v1288_v39, %v1287_v38  ;;  %v2378_v43 = vadd.f32 %v2377_v41, %v2376_v40  ;;  %v2379_v45 = vpop.f32.mrb[90].mxu0 }
 0x492   :  { %v2380_v60 = vpop.f32.mrb[91].mxu0 }
 0x493   :  { %v1175_v62 = vadd.f32 %v2378_v43, %v3455_v17  ;;  %2709 = vmatmul.mubr.bf16.vlgmr.msra.gmra.mrb[48].mxu1 %v1318_v42  ;;  %v2381_v0 = vadd.f32 %v2380_v60, %v2379_v45 }
 0x495   :  { %v1178_v1 = vadd.f32 %v2381_v0, %v3455_v17  ;;  %v1289_v2 = vmax.f32 %v1175_v62, 0.0 }
 0x497   :  { %v1290_v3 = vmax.f32 %v1178_v1, 0.0  ;;  %v2382_v4 = vpop.f32.mrb[92].mxu0 }
 0x498   :  { %v2383_v5 = vpop.f32.mrb[93].mxu0 }
 0x499   :  { %v2384_v6 = vadd.f32 %v2383_v5, %v2382_v4  ;;  %v2385_v48 = vpop.f32.mrb[94].mxu0  ;;  %v1319_v8 = vpack.c.bf16 %v1290_v3, %v1289_v2 }
 0x49a   :  { %v2386_v9 = vpop.f32.mrb[95].mxu0 }
 0x49b   :  { %v1183_v10 = vadd.f32 %v2384_v6, %v3455_v17  ;;  %v2387_v15 = vadd.f32 %v2386_v9, %v2385_v48  ;;  %2712 = vmatprep.mubr.bf16.mxu1 %v1319_v8 }
 0x49d   :  { %v1186_v16 = vadd.f32 %v2387_v15, %v3455_v17  ;;  %v1291_v44 = vmax.f32 %v1183_v10, 0.0 }
 0x49f   :  { %v1292_v46 = vmax.f32 %v1186_v16, 0.0  ;;  %v2388_v47 = vpop.f32.mrb[96].mxu0 }
 0x4a0   :  { %v2389_v63 = vpop.f32.mrb[97].mxu0 }
 0x4a1   :  { %v2390_v50 = vadd.f32 %v2389_v63, %v2388_v47  ;;  %v1320_v53 = vpack.c.bf16 %v1292_v46, %v1291_v44  ;;  %v2391_v55 = vpop.f32.mrb[98].mxu0 }
 0x4a2   :  { %v2392_v57 = vpop.f32.mrb[99].mxu0 }
 0x4a3   :  { %v1191_v49 = vadd.f32 %v2390_v50, %v3455_v17  ;;  %2713 = vmatmul.mubr.bf16.gmra.mrb[52].mxu1 %v1320_v53  ;;  %v2393_v52 = vadd.f32 %v2392_v57, %v2391_v55 }
 0x4a5   :  { %v1194_v58 = vadd.f32 %v2393_v52, %v3455_v17  ;;  %v1293_v59 = vmax.f32 %v1191_v49, 0.0 }
 0x4a7   :  { %v1294_v7 = vmax.f32 %v1194_v58, 0.0  ;;  %v2394_v61 = vpop.f32.mrb[100].mxu0 }
 0x4a8   :  { %v2395_v56 = vpop.f32.mrb[101].mxu0 }
 0x4a9   :  { %v2396_v24 = vadd.f32 %v2395_v56, %v2394_v61  ;;  %v2397_v54 = vpop.f32.mrb[102].mxu0  ;;  %v1321_v51 = vpack.c.bf16 %v1294_v7, %v1293_v59 }
 0x4aa   :  { %v2398_v25 = vpop.f32.mrb[103].mxu0 }
 0x4ab   :  { %v1199_v11 = vadd.f32 %v2396_v24, %v3455_v17  ;;  %v2399_v12 = vadd.f32 %v2398_v25, %v2397_v54  ;;  %2716 = vmatprep.mubr.bf16.mxu1 %v1321_v51 }
 0x4ad   :  { %v1202_v13 = vadd.f32 %v2399_v12, %v3455_v17  ;;  %v1295_v14 = vmax.f32 %v1199_v11, 0.0 }
 0x4af   :  { %v1296_v18 = vmax.f32 %v1202_v13, 0.0  ;;  %v2400_v19 = vpop.f32.mrb[104].mxu0 }
 0x4b0   :  { %v2401_v20 = vpop.f32.mrb[105].mxu0 }
 0x4b1   :  { %v2402_v21 = vadd.f32 %v2401_v20, %v2400_v19  ;;  %v1322_v22 = vpack.c.bf16 %v1296_v18, %v1295_v14  ;;  %v2403_v23 = vpop.f32.mrb[106].mxu0 }
 0x4b2   :  { %v2404_v26 = vpop.f32.mrb[107].mxu0 }
 0x4b3   :  { %v1207_v27 = vadd.f32 %v2402_v21, %v3455_v17  ;;  %2717 = vmatmul.mubr.bf16.gmra.mrb[56].mxu1 %v1322_v22  ;;  %v2405_v28 = vadd.f32 %v2404_v26, %v2403_v23 }
 0x4b5   :  { %v1210_v29 = vadd.f32 %v2405_v28, %v3455_v17  ;;  %v1297_v30 = vmax.f32 %v1207_v27, 0.0 }
 0x4b7   :  { %v1298_v31 = vmax.f32 %v1210_v29, 0.0  ;;  %v2406_v32 = vpop.f32.mrb[108].mxu0 }
 0x4b8   :  { %v2407_v33 = vpop.f32.mrb[109].mxu0 }
 0x4b9   :  { %v2408_v34 = vadd.f32 %v2407_v33, %v2406_v32  ;;  %v2409_v35 = vpop.f32.mrb[110].mxu0  ;;  %v1323_v36 = vpack.c.bf16 %v1298_v31, %v1297_v30 }
 0x4ba   :  { %v2410_v37 = vpop.f32.mrb[111].mxu0 }
 0x4bb   :  { %v1215_v38 = vadd.f32 %v2408_v34, %v3455_v17  ;;  %v2411_v39 = vadd.f32 %v2410_v37, %v2409_v35  ;;  %2720 = vmatprep.mubr.bf16.mxu1 %v1323_v36 }
 0x4bd   :  { %v1218_v40 = vadd.f32 %v2411_v39, %v3455_v17  ;;  %v1299_v41 = vmax.f32 %v1215_v38, 0.0 }
 0x4bf   :  { %v1300_v42 = vmax.f32 %v1218_v40, 0.0  ;;  %v2412_v43 = vpop.f32.mrb[112].mxu0 }
 0x4c0   :  { %v2413_v45 = vpop.f32.mrb[113].mxu0 }
 0x4c1   :  { %v2414_v60 = vadd.f32 %v2413_v45, %v2412_v43  ;;  %v2415_v62 = vpop.f32.mrb[114].mxu0  ;;  %v1324_v0 = vpack.c.bf16 %v1300_v42, %v1299_v41 }
 0x4c2   :  { %v2416_v1 = vpop.f32.mrb[115].mxu0 }
 0x4c3   :  { %v1223_v2 = vadd.f32 %v2414_v60, %v3455_v17  ;;  %2721 = vmatmul.mubr.bf16.gmra.mrb[60].mxu1 %v1324_v0  ;;  %v2417_v3 = vadd.f32 %v2416_v1, %v2415_v62 }
 0x4c5   :  { %v1226_v4 = vadd.f32 %v2417_v3, %v3455_v17  ;;  %v1301_v5 = vmax.f32 %v1223_v2, 0.0 }
 0x4c7   :  { %v1302_v6 = vmax.f32 %v1226_v4, 0.0  ;;  %v2418_v48 = vpop.f32.mrb[116].mxu0 }
 0x4c8   :  { %v2419_v8 = vpop.f32.mrb[117].mxu0 }
 0x4c9   :  { %v2420_v9 = vadd.f32 %v2419_v8, %v2418_v48  ;;  %v2421_v10 = vpop.f32.mrb[118].mxu0  ;;  %v1325_v15 = vpack.c.bf16 %v1302_v6, %v1301_v5 }
 0x4ca   :  { %v2422_v16 = vpop.f32.mrb[119].mxu0 }
 0x4cb   :  { %v1231_v44 = vadd.f32 %v2420_v9, %v3455_v17  ;;  %v2423_v46 = vadd.f32 %v2422_v16, %v2421_v10  ;;  %2724 = vmatprep.mubr.bf16.mxu1 %v1325_v15 }
 0x4cd   :  { %v1234_v47 = vadd.f32 %v2423_v46, %v3455_v17  ;;  %v1303_v63 = vmax.f32 %v1231_v44, 0.0 }
 0x4cf   :  { %v1304_v50 = vmax.f32 %v1234_v47, 0.0  ;;  %v2424_v53 = vpop.f32.mrb[120].mxu0 }
 0x4d0   :  { %v2425_v55 = vpop.f32.mrb[121].mxu0 }
 0x4d1   :  { %v1326_v57 = vpack.c.bf16 %v1304_v50, %v1303_v63  ;;  %v2426_v49 = vadd.f32 %v2425_v55, %v2424_v53  ;;  %v2427_v52 = vpop.f32.mrb[122].mxu0 }
 0x4d2   :  { %v2428_v58 = vpop.f32.mrb[123].mxu0 }
 0x4d3   :  { %2725 = vmatmul.mubr.bf16.gmra.mrb[64].mxu1 %v1326_v57  ;;  %v1239_v59 = vadd.f32 %v2426_v49, %v3455_v17  ;;  %v2429_v7 = vadd.f32 %v2428_v58, %v2427_v52  ;;  %v2982_v52 = vld [vmem:[#allocation5 + $0x4] ss:$8 sps:$4 sm:$0xff]  }
 0x4d5   :  { %v1242_v61 = vadd.f32 %v2429_v7, %v3455_v17  ;;  %v1305_v56 = vmax.f32 %v1239_v59, 0.0 }
 0x4d7   :  { %v1306_v24 = vmax.f32 %v1242_v61, 0.0  ;;  %v2430_v54 = vpop.f32.mrb[124].mxu0 }
 0x4d8   :  { %v2431_v51 = vpop.f32.mrb[125].mxu0 }
 0x4d9   :  { %v2432_v25 = vadd.f32 %v2431_v51, %v2430_v54  ;;  %v2433_v11 = vpop.f32.mrb[126].mxu0  ;;  %v1327_v12 = vpack.c.bf16 %v1306_v24, %v1305_v56 }
 0x4da   :  { %v2434_v13 = vpop.f32.mrb[127].mxu0 }
 0x4db   :  { %v1247_v14 = vadd.f32 %v2432_v25, %v3455_v17  ;;  %v2435_v18 = vadd.f32 %v2434_v13, %v2433_v11  ;;  %2728 = vmatprep.mubr.bf16.mxu1 %v1327_v12 }
 0x4dd   :  { %v1250_v19 = vadd.f32 %v2435_v18, %v3455_v17  ;;  %v1307_v20 = vmax.f32 %v1247_v14, 0.0 }
 0x4df   :  { %v1308_v21 = vmax.f32 %v1250_v19, 0.0  ;;  %v2436_v22 = vpop.f32.mrb[128].mxu0 }
 0x4e0   :  { %v2437_v23 = vpop.f32.mrb[129].mxu0 }
 0x4e1   :  { %v1328_v26 = vpack.c.bf16 %v1308_v21, %v1307_v20  ;;  %v2438_v27 = vadd.f32 %v2437_v23, %v2436_v22  ;;  %v2439_v28 = vpop.f32.mrb[130].mxu0 }
 0x4e2   :  { %v2440_v29 = vpop.f32.mrb[131].mxu0 }
 0x4e3   :  { %2729 = vmatmul.mubr.bf16.gmra.mrb[68].mxu1 %v1328_v26  ;;  %v1255_v30 = vadd.f32 %v2438_v27, %v3455_v17  ;;  %v2441_v31 = vadd.f32 %v2440_v29, %v2439_v28 }
 0x4e5   :  { %v1258_v32 = vadd.f32 %v2441_v31, %v3455_v17  ;;  %v1309_v33 = vmax.f32 %v1255_v30, 0.0 }
 0x4e7   :  { %v1310_v34 = vmax.f32 %v1258_v32, 0.0  ;;  %v2442_v35 = vpop.f32.mrb[132].mxu0 }
 0x4e8   :  { %v2443_v36 = vpop.f32.mrb[133].mxu0 }
 0x4e9   :  { %v2444_v37 = vadd.f32 %v2443_v36, %v2442_v35  ;;  %v2445_v38 = vpop.f32.mrb[134].mxu0  ;;  %v1329_v39 = vpack.c.bf16 %v1310_v34, %v1309_v33 }
 0x4ea   :  { %v2446_v40 = vpop.f32.mrb[135].mxu0 }
 0x4eb   :  { %v1263_v41 = vadd.f32 %v2444_v37, %v3455_v17  ;;  %v2447_v42 = vadd.f32 %v2446_v40, %v2445_v38  ;;  %2732 = vmatprep.mubr.bf16.mxu1 %v1329_v39 }
 0x4ed   :  { %v1266_v43 = vadd.f32 %v2447_v42, %v3455_v17  ;;  %v1311_v45 = vmax.f32 %v1263_v41, 0.0 }
 0x4ef   :  { %v1312_v60 = vmax.f32 %v1266_v43, 0.0  ;;  %v2448_v62 = vpop.f32.mrb[136].mxu0 }
 0x4f0   :  { %v2449_v0 = vpop.f32.mrb[137].mxu0 }
 0x4f1   :  { %v1330_v1 = vpack.c.bf16 %v1312_v60, %v1311_v45  ;;  %v2450_v2 = vadd.f32 %v2449_v0, %v2448_v62  ;;  %v2451_v3 = vpop.f32.mrb[138].mxu0 }
 0x4f2   :  { %v2452_v4 = vpop.f32.mrb[139].mxu0 }
 0x4f3   :  { %2733 = vmatmul.mubr.bf16.gmra.mrb[72].mxu1 %v1330_v1  ;;  %v1271_v5 = vadd.f32 %v2450_v2, %v3455_v17  ;;  %v2453_v6 = vadd.f32 %v2452_v4, %v2451_v3 }
 0x4f5   :  { %v1274_v48 = vadd.f32 %v2453_v6, %v3455_v17  ;;  %v1313_v8 = vmax.f32 %v1271_v5, 0.0 }
 0x4f7   :  { %v1314_v9 = vmax.f32 %v1274_v48, 0.0  ;;  %v2454_v10 = vpop.f32.mrb[140].mxu0  ;;  %v2983_v48 = vld [vmem:[#allocation5] ss:$8 sps:$4 sm:$0xff]  }
 0x4f8   :  { %v2455_v15 = vpop.f32.mrb[141].mxu0 }
 0x4f9   :  { %v2456_v16 = vadd.f32 %v2455_v15, %v2454_v10  ;;  %v2457_v44 = vpop.f32.mrb[142].mxu0  ;;  %v1331_v46 = vpack.c.bf16 %v1314_v9, %v1313_v8  ;;  %v2984_v8 = vld [vmem:[#allocation5 + $0x14] ss:$8 sps:$4 sm:$0xff]   ;;  %v2985_v9 = vld [vmem:[#allocation5 + $0x10] ss:$8 sps:$4 sm:$0xff]  }
 0x4fa   :  { %v2458_v47 = vpop.f32.mrb[143].mxu0  ;;  %v2986_v10 = vld [vmem:[#allocation5 + $0x24] ss:$8 sps:$4 sm:$0xff]   ;;  %v2987_v15 = vld [vmem:[#allocation5 + $0x20] ss:$8 sps:$4 sm:$0xff]  }
 0x4fb   :  { %v1279_v63 = vadd.f32 %v2456_v16, %v3455_v17  ;;  %v2459_v50 = vadd.f32 %v2458_v47, %v2457_v44  ;;  %2736 = vmatprep.mubr.bf16.mxu1 %v1331_v46  ;;  %v2988_v16 = vld [vmem:[#allocation5 + $0x34] ss:$8 sps:$4 sm:$0xff]   ;;  %v2989_v44 = vld [vmem:[#allocation5 + $0x30] ss:$8 sps:$4 sm:$0xff]   ;;  %v2990_v46 = vld [vmem:[#allocation5 + $0x44] ss:$8 sps:$4 sm:$0xff]  }
 0x4fc   :  { %v2991_v47 = vld [vmem:[#allocation5 + $0x40] ss:$8 sps:$4 sm:$0xff]  }
 0x4fd   :  { %v1282_v53 = vadd.f32 %v2459_v50, %v3455_v17  ;;  %v1315_v55 = vmax.f32 %v1279_v63, 0.0  ;;  %v2992_v63 = vld [vmem:[#allocation5 + $0x54] ss:$8 sps:$4 sm:$0xff]   ;;  %v2993_v50 = vld [vmem:[#allocation5 + $0x50] ss:$8 sps:$4 sm:$0xff]  }
 0x4ff   :  { %v1316_v57 = vmax.f32 %v1282_v53, 0.0  ;;  %v2994_v53 = vld [vmem:[#allocation5 + $0x64] ss:$8 sps:$4 sm:$0xff]  }
 0x501   :  { %v1332_v49 = vpack.c.bf16 %v1316_v57, %v1315_v55  ;;  %v2995_v55 = vld [vmem:[#allocation5 + $0x60] ss:$8 sps:$4 sm:$0xff]   ;;  %v2996_v57 = vld [vmem:[#allocation5 + $0x74] ss:$8 sps:$4 sm:$0xff]  }
 0x503   :  { %2737 = vmatmul.mubr.bf16.gmra.mrb[76].mxu1 %v1332_v49  ;;  %v2997_v49 = vld [vmem:[#allocation5 + $0x70] ss:$8 sps:$4 sm:$0xff]  }
 0x504   :  { %1613 = vmatprep.mubr.bf16.mxu1 %v2982_v52  ;;  %v2998_v52 = vld [vmem:[#allocation5 + $0x84] ss:$8 sps:$4 sm:$0xff]  }
 0x566   :  { %v2710_v58 = vpop.f32.mrb[48].mxu1 }
 0x567   :  { %v1431_v59 = vpop.f32.mrb[49].mxu1 }
 0x568   :  { %v2711_v7 = vpop.f32.mrb[50].mxu1 }
 0x569   :  { %v1559_v61 = vpack.c.bf16 %v2711_v7, %v2710_v58  ;;  %v1434_v56 = vpop.f32.mrb[51].mxu1  ;;  %v2999_v58 = vld [vmem:[#allocation5 + $0x80] ss:$8 sps:$4 sm:$0xff]   ;;  %v3001_v7 = vld [vmem:[#allocation5 + $0x90] ss:$8 sps:$4 sm:$0xff]  }
 0x56a   :  { %v1558_v24 = vpack.c.bf16 %v1434_v56, %v1431_v59  ;;  %v3000_v59 = vld [vmem:[#allocation5 + $0x94] ss:$8 sps:$4 sm:$0xff]   ;;  %v3003_v56 = vld [vmem:[#allocation5 + $0xa0] ss:$8 sps:$4 sm:$0xff]  }
 0x576   :  { %v2714_v54 = vpop.f32.mrb[52].mxu1 }
 0x577   :  { %v1447_v51 = vpop.f32.mrb[53].mxu1 }
 0x578   :  { %v2715_v25 = vpop.f32.mrb[54].mxu1 }
 0x579   :  { %v1561_v11 = vpack.c.bf16 %v2715_v25, %v2714_v54  ;;  %v1450_v12 = vpop.f32.mrb[55].mxu1  ;;  %v3005_v54 = vld [vmem:[#allocation5 + $0xb0] ss:$8 sps:$4 sm:$0xff]   ;;  %v3007_v25 = vld [vmem:[#allocation5 + $0xc0] ss:$8 sps:$4 sm:$0xff]  }
 0x57a   :  { %v1560_v13 = vpack.c.bf16 %v1450_v12, %v1447_v51  ;;  %v3006_v51 = vld [vmem:[#allocation5 + $0xc4] ss:$8 sps:$4 sm:$0xff]   ;;  %v3009_v12 = vld [vmem:[#allocation5 + $0xd0] ss:$8 sps:$4 sm:$0xff]  }
 0x586   :  { %v2718_v14 = vpop.f32.mrb[56].mxu1 }
 0x587   :  { %v1463_v17 = vpop.f32.mrb[57].mxu1 }
 0x588   :  { %v2719_v18 = vpop.f32.mrb[58].mxu1 }
 0x589   :  { %v1563_v19 = vpack.c.bf16 %v2719_v18, %v2718_v14  ;;  %v1466_v20 = vpop.f32.mrb[59].mxu1  ;;  %v3011_v14 = vld [vmem:[#allocation5 + $0xe0] ss:$8 sps:$4 sm:$0xff]   ;;  %v3013_v18 = vld [vmem:[#allocation5 + $0xf0] ss:$8 sps:$4 sm:$0xff]  }
 0x58a   :  { %v1562_v21 = vpack.c.bf16 %v1466_v20, %v1463_v17  ;;  %v3012_v17 = vld [vmem:[#allocation5 + $0xf4] ss:$8 sps:$4 sm:$0xff]  }
 0x596   :  { %v2722_v22 = vpop.f32.mrb[60].mxu1 }
 0x597   :  { %v1479_v23 = vpop.f32.mrb[61].mxu1 }
 0x598   :  { %v2723_v26 = vpop.f32.mrb[62].mxu1 }
 0x599   :  { %v1565_v27 = vpack.c.bf16 %v2723_v26, %v2722_v22  ;;  %v1482_v28 = vpop.f32.mrb[63].mxu1 }
 0x59a   :  { %v1564_v29 = vpack.c.bf16 %v1482_v28, %v1479_v23 }
 0x5a6   :  { %v2726_v30 = vpop.f32.mrb[64].mxu1 }
 0x5a7   :  { %v1495_v31 = vpop.f32.mrb[65].mxu1 }
 0x5a8   :  { %v2727_v32 = vpop.f32.mrb[66].mxu1 }
 0x5a9   :  { %v1567_v33 = vpack.c.bf16 %v2727_v32, %v2726_v30  ;;  %v1498_v34 = vpop.f32.mrb[67].mxu1 }
 0x5aa   :  { %v1566_v35 = vpack.c.bf16 %v1498_v34, %v1495_v31 }
 0x5ac   :  { %2484 = vmatprep.subr.bf16.mxu1 %v1566_v35 }
 0x5ad   :  { %2485 = vmatpush3.bf16.msra.mxu1 %v1558_v24  ;;  %v3004_v24 = vld [vmem:[#allocation5 + $0xb4] ss:$8 sps:$4 sm:$0xff]  }
 0x5ae   :  { %2486 = vmatprep.subr.bf16.mxu1 %v1567_v33 }
 0x5b1   :  { %2487 = vmatpush3.bf16.msra.mxu1 %v1559_v61  ;;  %v3002_v61 = vld [vmem:[#allocation5 + $0xa4] ss:$8 sps:$4 sm:$0xff]  }
 0x5b6   :  { %v2730_v36 = vpop.f32.mrb[68].mxu1 }
 0x5b7   :  { %v1511_v37 = vpop.f32.mrb[69].mxu1 }
 0x5b8   :  { %v2731_v38 = vpop.f32.mrb[70].mxu1 }
 0x5b9   :  { %v1569_v39 = vpack.c.bf16 %v2731_v38, %v2730_v36  ;;  %v1514_v40 = vpop.f32.mrb[71].mxu1 }
 0x5ba   :  { %v1568_v41 = vpack.c.bf16 %v1514_v40, %v1511_v37 }
 0x5bc   :  { %2488 = vmatprep.subr.bf16.mxu1 %v1568_v41 }
 0x5bd   :  { %2489 = vmatpush3.bf16.msra.mxu1 %v1560_v13  ;;  %v3010_v13 = vld [vmem:[#allocation5 + $0xe4] ss:$8 sps:$4 sm:$0xff]  }
 0x5be   :  { %2490 = vmatprep.subr.bf16.mxu1 %v1569_v39 }
 0x5c1   :  { %2491 = vmatpush3.bf16.msra.mxu1 %v1561_v11  ;;  %v3008_v11 = vld [vmem:[#allocation5 + $0xd4] ss:$8 sps:$4 sm:$0xff]  }
 0x5c6   :  { %v2734_v42 = vpop.f32.mrb[72].mxu1 }
 0x5c7   :  { %v1527_v43 = vpop.f32.mrb[73].mxu1 }
 0x5c8   :  { %v2735_v45 = vpop.f32.mrb[74].mxu1 }
 0x5c9   :  { %v1571_v60 = vpack.c.bf16 %v2735_v45, %v2734_v42  ;;  %v1530_v62 = vpop.f32.mrb[75].mxu1 }
 0x5ca   :  { %v1570_v0 = vpack.c.bf16 %v1530_v62, %v1527_v43 }
 0x5cc   :  { %2492 = vmatprep.subr.bf16.mxu1 %v1570_v0 }
 0x5cd   :  { %2493 = vmatpush3.bf16.msra.mxu1 %v1562_v21  ;;  %v3492_v21 = vld [vmem:[%s3804_s7] ss:$0 sm:$0xff]  ;;  %s3163_s7 = smov [#allocation11]  }
 0x5ce   :  { %2494 = vmatprep.subr.bf16.mxu1 %v1571_v60  ;;  %s2099_s27 = sshll.u32 %s3163_s7, 4  ;;  %s2100_s27 = int_to_ptr.vmem [resolvable:$true] %s2099_s27 }
 0x5cf   :  { %s3124_s29 = scalar_lea.vmem %s2100_s27, 4096  ;;  %p3129_p13 = scmp.lt.s32.totalorder %s2100_s27, %s2100_s27 }
 0x5d0   :  { %p3125_p12 = scmp.ne.s32.totalorder %s2100_s27, %s3124_s29  ;;  %p3130_p0 = scmp.lt.s32.totalorder %s3124_s29, %s3124_s29 }
 0x5d1   :  { %2495 = vmatpush3.bf16.msra.mxu1 %v1563_v19 }
 0x5d2   :  { %p3131_p1 = por %p3130_p0, %p3129_p13 }
 0x5d4   :  { %p3132_p2 = pnand %p3131_p1, %p3125_p12 }
 0x5d6   :  { %v2738_v1 = vpop.f32.mrb[76].mxu1 }
 0x5d7   :  { %v1543_v2 = vpop.f32.mrb[77].mxu1 }
 0x5d8   :  { %v2739_v3 = vpop.f32.mrb[78].mxu1 }
 0x5d9   :  { %v1573_v4 = vpack.c.bf16 %v2739_v3, %v2738_v1  ;;  %v1546_v5 = vpop.f32.mrb[79].mxu1 }
 0x5da   :  { %v1572_v6 = vpack.c.bf16 %v1546_v5, %v1543_v2 }
 0x5dc   :  { %2496 = vmatprep.subr.bf16.mxu1 %v1572_v6 }
 0x5dd   :  { %2497 = vmatpush3.bf16.msra.mxu1 %v1564_v29 }
 0x5de   :  { %2498 = vmatprep.subr.bf16.mxu1 %v1573_v4 }
 0x5e1   :  { %2499 = vmatpush3.bf16.msra.mxu1 %v1565_v27 }
 0x5e4   :  { %1614 = vmatmul.mubr.bf16.vlgmr.msra.gmra.mrb[80].mxu1 %v2983_v48 }
 0x5e5   :  { %1621 = vmatprep.mubr.bf16.mxu1 %v2984_v8 }
 0x5ec   :  { %1622 = vmatmul.mubr.bf16.gmra.mrb[84].mxu1 %v2985_v9 }
 0x5ed   :  { %1629 = vmatprep.mubr.bf16.mxu1 %v2986_v10 }
 0x5f4   :  { %1630 = vmatmul.mubr.bf16.gmra.mrb[88].mxu1 %v2987_v15 }
 0x5f5   :  { %1637 = vmatprep.mubr.bf16.mxu1 %v2988_v16 }
 0x5fc   :  { %1638 = vmatmul.mubr.bf16.gmra.mrb[92].mxu1 %v2989_v44 }
 0x5fd   :  { %1645 = vmatprep.mubr.bf16.mxu1 %v2990_v46 }
 0x604   :  { %1646 = vmatmul.mubr.bf16.gmra.mrb[96].mxu1 %v2991_v47 }
 0x605   :  { %1653 = vmatprep.mubr.bf16.mxu1 %v2992_v63 }
 0x60c   :  { %1654 = vmatmul.mubr.bf16.gmra.mrb[100].mxu1 %v2993_v50 }
 0x60d   :  { %1661 = vmatprep.mubr.bf16.mxu1 %v2994_v53 }
 0x614   :  { %1662 = vmatmul.mubr.bf16.gmra.mrb[104].mxu1 %v2995_v55 }
 0x615   :  { %1669 = vmatprep.mubr.bf16.mxu1 %v2996_v57 }
 0x61c   :  { %1670 = vmatmul.mubr.bf16.gmra.mrb[108].mxu1 %v2997_v49 }
 0x61d   :  { %1677 = vmatprep.mubr.bf16.mxu1 %v2998_v52 }
 0x624   :  { %1678 = vmatmul.mubr.bf16.gmra.mrb[112].mxu1 %v2999_v58 }
 0x625   :  { %1685 = vmatprep.mubr.bf16.mxu1 %v3000_v59 }
 0x62c   :  { %1686 = vmatmul.mubr.bf16.gmra.mrb[116].mxu1 %v3001_v7 }
 0x62d   :  { %1693 = vmatprep.mubr.bf16.mxu1 %v3002_v61 }
 0x634   :  { %1694 = vmatmul.mubr.bf16.gmra.mrb[120].mxu1 %v3003_v56 }
 0x635   :  { %1701 = vmatprep.mubr.bf16.mxu1 %v3004_v24 }
 0x63c   :  { %1702 = vmatmul.mubr.bf16.gmra.mrb[124].mxu1 %v3005_v54 }
 0x63d   :  { %1709 = vmatprep.mubr.bf16.mxu1 %v3006_v51 }
 0x644   :  { %1710 = vmatmul.mubr.bf16.gmra.mrb[128].mxu1 %v3007_v25 }
 0x645   :  { %1717 = vmatprep.mubr.bf16.mxu1 %v3008_v11 }
 0x64c   :  { %1718 = vmatmul.mubr.bf16.gmra.mrb[132].mxu1 %v3009_v12 }
 0x64d   :  { %1725 = vmatprep.mubr.bf16.mxu1 %v3010_v13 }
 0x654   :  { %1726 = vmatmul.mubr.bf16.gmra.mrb[136].mxu1 %v3011_v14 }
 0x655   :  { %1733 = vmatprep.mubr.bf16.mxu1 %v3012_v17 }
 0x65c   :  { %1734 = vmatmul.mubr.bf16.gmra.mrb[140].mxu1 %v3013_v18 }
 0x6b7   :  { %v2500_v19 = vpop.f32.mrb[80].mxu1 }
 0x6b8   :  { %v2501_v20 = vpop.f32.mrb[81].mxu1 }
 0x6b9   :  { %v2502_v22 = vadd.f32 %v2501_v20, %v2500_v19  ;;  %v2503_v23 = vpop.f32.mrb[82].mxu1 }
 0x6ba   :  { %v2504_v26 = vpop.f32.mrb[83].mxu1 }
 0x6bb   :  { %v2505_v27 = vadd.f32 %v2504_v26, %v2503_v23  ;;  %v3495_v28 = vadd.f32 %v2502_v22, %v3492_v21 }
 0x6bd   :  { %1742 = vmax.xlane.f32.xlu0 %v3495_v28  ;;  %v3499_v30 = vadd.f32 %v2505_v27, %v3492_v21 }
 0x6bf   :  { %v2506_v29 = vpop.f32.mrb[84].mxu1 }
 0x6c0   :  { %v2507_v31 = vpop.f32.mrb[85].mxu1 }
 0x6c1   :  { %v2508_v32 = vadd.f32 %v2507_v31, %v2506_v29  ;;  %1744 = vmax.xlane.f32.xlu0 %v3499_v30  ;;  %v2509_v33 = vpop.f32.mrb[86].mxu1 }
 0x6c2   :  { %v2510_v34 = vpop.f32.mrb[87].mxu1 }
 0x6c3   :  { %v2511_v35 = vadd.f32 %v2510_v34, %v2509_v33  ;;  %v3503_v36 = vadd.f32 %v2508_v32, %v3492_v21 }
 0x6c5   :  { %1746 = vmax.xlane.f32.xlu1 %v3503_v36  ;;  %v3507_v38 = vadd.f32 %v2511_v35, %v3492_v21 }
 0x6c7   :  { %v2512_v37 = vpop.f32.mrb[88].mxu1 }
 0x6c8   :  { %v2513_v39 = vpop.f32.mrb[89].mxu1 }
 0x6c9   :  { %v2514_v40 = vadd.f32 %v2513_v39, %v2512_v37  ;;  %v2515_v41 = vpop.f32.mrb[90].mxu1  ;;  %1748 = vmax.xlane.f32.xlu1 %v3507_v38 }
 0x6ca   :  { %v2516_v42 = vpop.f32.mrb[91].mxu1 }
 0x6cb   :  { %v2517_v43 = vadd.f32 %v2516_v42, %v2515_v41  ;;  %v3511_v45 = vadd.f32 %v2514_v40, %v3492_v21 }
 0x6cd   :  { %1750 = vmax.xlane.f32.xlu0 %v3511_v45  ;;  %v3515_v60 = vadd.f32 %v2517_v43, %v3492_v21 }
 0x6cf   :  { %v2518_v62 = vpop.f32.mrb[92].mxu1  ;;  %1752 = vmax.xlane.f32.xlu1 %v3515_v60 }
 0x6d0   :  { %v2519_v0 = vpop.f32.mrb[93].mxu1 }
 0x6d1   :  { %v2520_v1 = vadd.f32 %v2519_v0, %v2518_v62  ;;  %v2521_v2 = vpop.f32.mrb[94].mxu1 }
 0x6d2   :  { %v2522_v3 = vpop.f32.mrb[95].mxu1 }
 0x6d3   :  { %v2523_v4 = vadd.f32 %v2522_v3, %v2521_v2  ;;  %v3519_v5 = vadd.f32 %v2520_v1, %v3492_v21 }
 0x6d5   :  { %1754 = vmax.xlane.f32.xlu0 %v3519_v5  ;;  %v3523_v6 = vadd.f32 %v2523_v4, %v3492_v21 }
 0x6d7   :  { %v2524_v48 = vpop.f32.mrb[96].mxu1  ;;  %1756 = vmax.xlane.f32.xlu1 %v3523_v6 }
 0x6d8   :  { %v2525_v8 = vpop.f32.mrb[97].mxu1 }
 0x6d9   :  { %v2526_v9 = vadd.f32 %v2525_v8, %v2524_v48  ;;  %v2527_v10 = vpop.f32.mrb[98].mxu1 }
 0x6da   :  { %v2528_v15 = vpop.f32.mrb[99].mxu1 }
 0x6db   :  { %v2529_v16 = vadd.f32 %v2528_v15, %v2527_v10  ;;  %v3527_v44 = vadd.f32 %v2526_v9, %v3492_v21 }
 0x6dd   :  { %1758 = vmax.xlane.f32.xlu0 %v3527_v44  ;;  %v3531_v46 = vadd.f32 %v2529_v16, %v3492_v21 }
 0x6df   :  { %v2530_v47 = vpop.f32.mrb[100].mxu1  ;;  %1760 = vmax.xlane.f32.xlu1 %v3531_v46 }
 0x6e0   :  { %v2531_v63 = vpop.f32.mrb[101].mxu1 }
 0x6e1   :  { %v2532_v50 = vadd.f32 %v2531_v63, %v2530_v47  ;;  %v2533_v53 = vpop.f32.mrb[102].mxu1 }
 0x6e2   :  { %v2534_v55 = vpop.f32.mrb[103].mxu1 }
 0x6e3   :  { %v2535_v57 = vadd.f32 %v2534_v55, %v2533_v53  ;;  %v3535_v49 = vadd.f32 %v2532_v50, %v3492_v21 }
 0x6e5   :  { %1762 = vmax.xlane.f32.xlu0 %v3535_v49  ;;  %v3539_v52 = vadd.f32 %v2535_v57, %v3492_v21 }
 0x6e7   :  { %v2536_v58 = vpop.f32.mrb[104].mxu1  ;;  %1764 = vmax.xlane.f32.xlu1 %v3539_v52 }
 0x6e8   :  { %v2537_v59 = vpop.f32.mrb[105].mxu1 }
 0x6e9   :  { %v2538_v7 = vadd.f32 %v2537_v59, %v2536_v58  ;;  %v2539_v61 = vpop.f32.mrb[106].mxu1 }
 0x6ea   :  { %v2540_v56 = vpop.f32.mrb[107].mxu1 }
 0x6eb   :  { %v2541_v24 = vadd.f32 %v2540_v56, %v2539_v61  ;;  %v3543_v54 = vadd.f32 %v2538_v7, %v3492_v21 }
 0x6ed   :  { %1766 = vmax.xlane.f32.xlu0 %v3543_v54  ;;  %v3547_v51 = vadd.f32 %v2541_v24, %v3492_v21 }
 0x6ef   :  { %v2542_v25 = vpop.f32.mrb[108].mxu1  ;;  %1768 = vmax.xlane.f32.xlu1 %v3547_v51 }
 0x6f0   :  { %v2543_v11 = vpop.f32.mrb[109].mxu1 }
 0x6f1   :  { %v2544_v12 = vadd.f32 %v2543_v11, %v2542_v25  ;;  %v2545_v13 = vpop.f32.mrb[110].mxu1 }
 0x6f2   :  { %v2546_v14 = vpop.f32.mrb[111].mxu1 }
 0x6f3   :  { %v2547_v17 = vadd.f32 %v2546_v14, %v2545_v13  ;;  %v3551_v18 = vadd.f32 %v2544_v12, %v3492_v21 }
 0x6f5   :  { %1770 = vmax.xlane.f32.xlu0 %v3551_v18  ;;  %v3555_v19 = vadd.f32 %v2547_v17, %v3492_v21 }
 0x6f7   :  { %v2548_v20 = vpop.f32.mrb[112].mxu1  ;;  %1772 = vmax.xlane.f32.xlu1 %v3555_v19 }
 0x6f8   :  { %v2549_v22 = vpop.f32.mrb[113].mxu1 }
 0x6f9   :  { %v2550_v23 = vadd.f32 %v2549_v22, %v2548_v20  ;;  %v2551_v26 = vpop.f32.mrb[114].mxu1 }
 0x6fa   :  { %v2552_v27 = vpop.f32.mrb[115].mxu1 }
 0x6fb   :  { %v2553_v29 = vadd.f32 %v2552_v27, %v2551_v26  ;;  %v3559_v31 = vadd.f32 %v2550_v23, %v3492_v21 }
 0x6fd   :  { %1774 = vmax.xlane.f32.xlu0 %v3559_v31  ;;  %v3563_v32 = vadd.f32 %v2553_v29, %v3492_v21 }
 0x6ff   :  { %v2554_v33 = vpop.f32.mrb[116].mxu1  ;;  %1776 = vmax.xlane.f32.xlu1 %v3563_v32 }
 0x700   :  { %v2555_v34 = vpop.f32.mrb[117].mxu1 }
 0x701   :  { %v2556_v35 = vadd.f32 %v2555_v34, %v2554_v33  ;;  %v2557_v37 = vpop.f32.mrb[118].mxu1 }
 0x702   :  { %v2558_v39 = vpop.f32.mrb[119].mxu1 }
 0x703   :  { %v2559_v40 = vadd.f32 %v2558_v39, %v2557_v37  ;;  %v3567_v41 = vadd.f32 %v2556_v35, %v3492_v21 }
 0x705   :  { %1778 = vmax.xlane.f32.xlu0 %v3567_v41  ;;  %v3571_v42 = vadd.f32 %v2559_v40, %v3492_v21 }
 0x707   :  { %v2560_v43 = vpop.f32.mrb[120].mxu1  ;;  %1780 = vmax.xlane.f32.xlu1 %v3571_v42 }
 0x708   :  { %v2561_v62 = vpop.f32.mrb[121].mxu1 }
 0x709   :  { %v2562_v0 = vadd.f32 %v2561_v62, %v2560_v43  ;;  %v2563_v1 = vpop.f32.mrb[122].mxu1 }
 0x70a   :  { %v2564_v2 = vpop.f32.mrb[123].mxu1 }
 0x70b   :  { %v2565_v3 = vadd.f32 %v2564_v2, %v2563_v1  ;;  %v3575_v4 = vadd.f32 %v2562_v0, %v3492_v21 }
 0x70d   :  { %1782 = vmax.xlane.f32.xlu0 %v3575_v4  ;;  %v3579_v48 = vadd.f32 %v2565_v3, %v3492_v21 }
 0x70f   :  { %v2566_v8 = vpop.f32.mrb[124].mxu1  ;;  %1784 = vmax.xlane.f32.xlu1 %v3579_v48 }
 0x710   :  { %v2567_v9 = vpop.f32.mrb[125].mxu1 }
 0x711   :  { %v2568_v10 = vadd.f32 %v2567_v9, %v2566_v8  ;;  %v2569_v15 = vpop.f32.mrb[126].mxu1 }
 0x712   :  { %v2570_v16 = vpop.f32.mrb[127].mxu1 }
 0x713   :  { %v2571_v47 = vadd.f32 %v2570_v16, %v2569_v15  ;;  %v3583_v63 = vadd.f32 %v2568_v10, %v3492_v21 }
 0x715   :  { %1786 = vmax.xlane.f32.xlu0 %v3583_v63  ;;  %v3587_v50 = vadd.f32 %v2571_v47, %v3492_v21 }
 0x717   :  { %v2572_v53 = vpop.f32.mrb[128].mxu1  ;;  %1788 = vmax.xlane.f32.xlu1 %v3587_v50 }
 0x718   :  { %v2573_v55 = vpop.f32.mrb[129].mxu1 }
 0x719   :  { %v2574_v57 = vadd.f32 %v2573_v55, %v2572_v53  ;;  %v2575_v58 = vpop.f32.mrb[130].mxu1 }
 0x71a   :  { %v2576_v59 = vpop.f32.mrb[131].mxu1 }
 0x71b   :  { %v2577_v7 = vadd.f32 %v2576_v59, %v2575_v58  ;;  %v3591_v61 = vadd.f32 %v2574_v57, %v3492_v21 }
 0x71d   :  { %1790 = vmax.xlane.f32.xlu0 %v3591_v61  ;;  %v3595_v56 = vadd.f32 %v2577_v7, %v3492_v21 }
 0x71f   :  { %v2578_v24 = vpop.f32.mrb[132].mxu1  ;;  %1792 = vmax.xlane.f32.xlu1 %v3595_v56 }
 0x720   :  { %v2579_v25 = vpop.f32.mrb[133].mxu1 }
 0x721   :  { %v2580_v11 = vadd.f32 %v2579_v25, %v2578_v24  ;;  %v2581_v12 = vpop.f32.mrb[134].mxu1 }
 0x722   :  { %v2582_v13 = vpop.f32.mrb[135].mxu1 }
 0x723   :  { %v2583_v14 = vadd.f32 %v2582_v13, %v2581_v12  ;;  %v3599_v17 = vadd.f32 %v2580_v11, %v3492_v21 }
 0x725   :  { %1794 = vmax.xlane.f32.xlu0 %v3599_v17  ;;  %v3603_v20 = vadd.f32 %v2583_v14, %v3492_v21 }
 0x727   :  { %v2584_v22 = vpop.f32.mrb[136].mxu1  ;;  %1796 = vmax.xlane.f32.xlu1 %v3603_v20 }
 0x728   :  { %v2585_v23 = vpop.f32.mrb[137].mxu1 }
 0x729   :  { %v2586_v26 = vadd.f32 %v2585_v23, %v2584_v22  ;;  %v2587_v27 = vpop.f32.mrb[138].mxu1 }
 0x72a   :  { %v2588_v29 = vpop.f32.mrb[139].mxu1 }
 0x72b   :  { %v2589_v33 = vadd.f32 %v2588_v29, %v2587_v27  ;;  %v3607_v34 = vadd.f32 %v2586_v26, %v3492_v21 }
 0x72d   :  { %1798 = vmax.xlane.f32.xlu0 %v3607_v34  ;;  %v3611_v35 = vadd.f32 %v2589_v33, %v3492_v21 }
 0x72f   :  { %v2590_v37 = vpop.f32.mrb[140].mxu1  ;;  %1800 = vmax.xlane.f32.xlu1 %v3611_v35 }
 0x730   :  { %v2591_v39 = vpop.f32.mrb[141].mxu1 }
 0x731   :  { %v2592_v40 = vadd.f32 %v2591_v39, %v2590_v37  ;;  %v2593_v43 = vpop.f32.mrb[142].mxu1 }
 0x732   :  { %v2594_v62 = vpop.f32.mrb[143].mxu1 }
 0x733   :  { %v2595_v0 = vadd.f32 %v2594_v62, %v2593_v43  ;;  %v3615_v1 = vadd.f32 %v2592_v40, %v3492_v21 }
 0x735   :  { %1802 = vmax.xlane.f32.xlu0 %v3615_v1  ;;  %v3619_v2 = vadd.f32 %v2595_v0, %v3492_v21 }
 0x737   :  { %1804 = vmax.xlane.f32.xlu1 %v3619_v2 }
 0x74a   :  { %v1743_v3 = vpop.xlane.xlu0 %1742 }
 0x74b   :  { %v3623_v8 = vsub.f32 %v3495_v28, %v1743_v3 }
 0x74d   :  { %v1838_v9 = vmul.f32 1.442695, %v3623_v8 }
 0x74e   :  { %v1745_v10 = vpop.xlane.xlu0 %1744 }
 0x74f   :  { %2854 = vpow2.f32 %v1838_v9  ;;  %v3627_v15 = vsub.f32 %v3499_v30, %v1745_v10 }
 0x751   :  { %v1840_v16 = vmul.f32 1.442695, %v3627_v15 }
 0x752   :  { %v1747_v47 = vpop.xlane.xlu1 %1746 }
 0x753   :  { %2856 = vpow2.f32 %v1840_v16  ;;  %v3631_v21 = vsub.f32 %v3503_v36, %v1747_v47 }
 0x755   :  { %v1842_v53 = vmul.f32 1.442695, %v3631_v21 }
 0x756   :  { %v1749_v55 = vpop.xlane.xlu1 %1748 }
 0x757   :  { %2858 = vpow2.f32 %v1842_v53  ;;  %v3635_v28 = vsub.f32 %v3507_v38, %v1749_v55 }
 0x759   :  { %v2855_v57 = vpop.eup %2854  ;;  %v1844_v58 = vmul.f32 1.442695, %v3635_v28 }
 0x75a   :  { %1902 = vadd.xlane.f32.xlu0 %v2855_v57  ;;  %v1751_v30 = vpop.xlane.xlu0 %1750 }
 0x75b   :  { %2860 = vpow2.f32 %v1844_v58  ;;  %v3639_v59 = vsub.f32 %v3511_v45, %v1751_v30 }
 0x75c   :  { %v1753_v7 = vpop.xlane.xlu1 %1752 }
 0x75d   :  { %v2857_v24 = vpop.eup %2856  ;;  %v1846_v36 = vmul.f32 1.442695, %v3639_v59  ;;  %v3643_v25 = vsub.f32 %v3515_v60, %v1753_v7 }
 0x75e   :  { %1904 = vadd.xlane.f32.xlu1 %v2857_v24 }
 0x75f   :  { %2862 = vpow2.f32 %v1846_v36  ;;  %v1848_v38 = vmul.f32 1.442695, %v3643_v25 }
 0x761   :  { %v2859_v11 = vpop.eup %2858  ;;  %2864 = vpow2.f32 %v1848_v38 }
 0x762   :  { %1906 = vadd.xlane.f32.xlu0 %v2859_v11  ;;  %v1755_v12 = vpop.xlane.xlu0 %1754 }
 0x763   :  { %v3647_v13 = vsub.f32 %v3519_v5, %v1755_v12 }
 0x764   :  { %v1757_v45 = vpop.xlane.xlu1 %1756 }
 0x765   :  { %v2861_v14 = vpop.eup %2860  ;;  %v1850_v22 = vmul.f32 1.442695, %v3647_v13  ;;  %v3651_v23 = vsub.f32 %v3523_v6, %v1757_v45 }
 0x766   :  { %1908 = vadd.xlane.f32.xlu1 %v2861_v14 }
 0x767   :  { %2866 = vpow2.f32 %v1850_v22  ;;  %v1852_v60 = vmul.f32 1.442695, %v3651_v23 }
 0x769   :  { %v2863_v26 = vpop.eup %2862  ;;  %2868 = vpow2.f32 %v1852_v60 }
 0x76a   :  { %1910 = vadd.xlane.f32.xlu0 %v2863_v26  ;;  %v1759_v27 = vpop.xlane.xlu0 %1758 }
 0x76b   :  { %v2865_v29 = vpop.eup %2864  ;;  %v3655_v33 = vsub.f32 %v3527_v44, %v1759_v27 }
 0x76c   :  { %v1761_v5 = vpop.xlane.xlu1 %1760  ;;  %1912 = vadd.xlane.f32.xlu1 %v2865_v29 }
 0x76d   :  { %v1854_v37 = vmul.f32 1.442695, %v3655_v33  ;;  %v3659_v39 = vsub.f32 %v3531_v46, %v1761_v5 }
 0x76f   :  { %2870 = vpow2.f32 %v1854_v37  ;;  %v1856_v6 = vmul.f32 1.442695, %v3659_v39 }
 0x771   :  { %v2867_v40 = vpop.eup %2866  ;;  %2872 = vpow2.f32 %v1856_v6 }
 0x772   :  { %1914 = vadd.xlane.f32.xlu0 %v2867_v40  ;;  %v1763_v43 = vpop.xlane.xlu0 %1762 }
 0x773   :  { %v2869_v62 = vpop.eup %2868  ;;  %v3663_v0 = vsub.f32 %v3535_v49, %v1763_v43 }
 0x774   :  { %v1765_v44 = vpop.xlane.xlu1 %1764  ;;  %1916 = vadd.xlane.f32.xlu1 %v2869_v62 }
 0x775   :  { %v1858_v3 = vmul.f32 1.442695, %v3663_v0  ;;  %v3667_v9 = vsub.f32 %v3539_v52, %v1765_v44 }
 0x777   :  { %2874 = vpow2.f32 %v1858_v3  ;;  %v1860_v46 = vmul.f32 1.442695, %v3667_v9 }
 0x779   :  { %v2871_v10 = vpop.eup %2870  ;;  %2876 = vpow2.f32 %v1860_v46 }
 0x77a   :  { %1918 = vadd.xlane.f32.xlu0 %v2871_v10  ;;  %v1767_v16 = vpop.xlane.xlu0 %1766 }
 0x77b   :  { %v2873_v47 = vpop.eup %2872  ;;  %v3671_v53 = vsub.f32 %v3543_v54, %v1767_v16 }
 0x77c   :  { %v1769_v49 = vpop.xlane.xlu1 %1768  ;;  %1920 = vadd.xlane.f32.xlu1 %v2873_v47 }
 0x77d   :  { %v1862_v55 = vmul.f32 1.442695, %v3671_v53  ;;  %v3675_v57 = vsub.f32 %v3547_v51, %v1769_v49 }
 0x77f   :  { %2878 = vpow2.f32 %v1862_v55  ;;  %v1864_v52 = vmul.f32 1.442695, %v3675_v57 }
 0x781   :  { %v2875_v58 = vpop.eup %2874  ;;  %2880 = vpow2.f32 %v1864_v52 }
 0x782   :  { %1922 = vadd.xlane.f32.xlu0 %v2875_v58  ;;  %v1771_v30 = vpop.xlane.xlu0 %1770 }
 0x783   :  { %v2877_v7 = vpop.eup %2876  ;;  %v3679_v24 = vsub.f32 %v3551_v18, %v1771_v30 }
 0x784   :  { %v1773_v54 = vpop.xlane.xlu1 %1772  ;;  %1924 = vadd.xlane.f32.xlu1 %v2877_v7 }
 0x785   :  { %v1866_v36 = vmul.f32 1.442695, %v3679_v24  ;;  %v3683_v38 = vsub.f32 %v3555_v19, %v1773_v54 }
 0x787   :  { %2882 = vpow2.f32 %v1866_v36  ;;  %v1868_v51 = vmul.f32 1.442695, %v3683_v38 }
 0x789   :  { %v2879_v11 = vpop.eup %2878  ;;  %2884 = vpow2.f32 %v1868_v51 }
 0x78a   :  { %1926 = vadd.xlane.f32.xlu0 %v2879_v11  ;;  %v1775_v12 = vpop.xlane.xlu0 %1774 }
 0x78b   :  { %v2881_v45 = vpop.eup %2880  ;;  %v3687_v14 = vsub.f32 %v3559_v31, %v1775_v12 }
 0x78c   :  { %v1777_v18 = vpop.xlane.xlu1 %1776  ;;  %1928 = vadd.xlane.f32.xlu1 %v2881_v45 }
 0x78d   :  { %v1870_v22 = vmul.f32 1.442695, %v3687_v14  ;;  %v3691_v60 = vsub.f32 %v3563_v32, %v1777_v18 }
 0x78f   :  { %2886 = vpow2.f32 %v1870_v22  ;;  %v1872_v19 = vmul.f32 1.442695, %v3691_v60 }
 0x791   :  { %v2883_v26 = vpop.eup %2882  ;;  %2888 = vpow2.f32 %v1872_v19 }
 0x792   :  { %1930 = vadd.xlane.f32.xlu0 %v2883_v26  ;;  %v1779_v27 = vpop.xlane.xlu0 %1778 }
 0x793   :  { %v2885_v29 = vpop.eup %2884  ;;  %v3695_v5 = vsub.f32 %v3567_v41, %v1779_v27 }
 0x794   :  { %v1781_v31 = vpop.xlane.xlu1 %1780  ;;  %1932 = vadd.xlane.f32.xlu1 %v2885_v29 }
 0x795   :  { %v1874_v37 = vmul.f32 1.442695, %v3695_v5  ;;  %v3699_v6 = vsub.f32 %v3571_v42, %v1781_v31 }
 0x797   :  { %2890 = vpow2.f32 %v1874_v37  ;;  %v1876_v32 = vmul.f32 1.442695, %v3699_v6 }
 0x799   :  { %v2887_v40 = vpop.eup %2886  ;;  %2892 = vpow2.f32 %v1876_v32 }
 0x79a   :  { %1934 = vadd.xlane.f32.xlu0 %v2887_v40  ;;  %v1783_v43 = vpop.xlane.xlu0 %1782 }
 0x79b   :  { %v2889_v62 = vpop.eup %2888  ;;  %v3703_v44 = vsub.f32 %v3575_v4, %v1783_v43 }
 0x79c   :  { %v1785_v41 = vpop.xlane.xlu1 %1784  ;;  %1936 = vadd.xlane.f32.xlu1 %v2889_v62 }
 0x79d   :  { %v1878_v3 = vmul.f32 1.442695, %v3703_v44  ;;  %v3707_v46 = vsub.f32 %v3579_v48, %v1785_v41 }
 0x79f   :  { %2894 = vpow2.f32 %v1878_v3  ;;  %v1880_v42 = vmul.f32 1.442695, %v3707_v46 }
 0x7a1   :  { %v2891_v10 = vpop.eup %2890  ;;  %2896 = vpow2.f32 %v1880_v42 }
 0x7a2   :  { %1938 = vadd.xlane.f32.xlu0 %v2891_v10  ;;  %v1787_v16 = vpop.xlane.xlu0 %1786 }
 0x7a3   :  { %v2893_v47 = vpop.eup %2892  ;;  %v3711_v49 = vsub.f32 %v3583_v63, %v1787_v16 }
 0x7a4   :  { %v1789_v4 = vpop.xlane.xlu1 %1788  ;;  %1940 = vadd.xlane.f32.xlu1 %v2893_v47 }
 0x7a5   :  { %v1882_v55 = vmul.f32 1.442695, %v3711_v49  ;;  %v3715_v52 = vsub.f32 %v3587_v50, %v1789_v4 }
 0x7a7   :  { %2898 = vpow2.f32 %v1882_v55  ;;  %v1884_v48 = vmul.f32 1.442695, %v3715_v52 }
 0x7a9   :  { %v2895_v58 = vpop.eup %2894  ;;  %2900 = vpow2.f32 %v1884_v48 }
 0x7aa   :  { %1942 = vadd.xlane.f32.xlu0 %v2895_v58  ;;  %v1791_v30 = vpop.xlane.xlu0 %1790 }
 0x7ab   :  { %v2897_v7 = vpop.eup %2896  ;;  %v3719_v54 = vsub.f32 %v3591_v61, %v1791_v30 }
 0x7ac   :  { %v1793_v63 = vpop.xlane.xlu1 %1792  ;;  %1944 = vadd.xlane.f32.xlu1 %v2897_v7 }
 0x7ad   :  { %v1886_v36 = vmul.f32 1.442695, %v3719_v54  ;;  %v3723_v51 = vsub.f32 %v3595_v56, %v1793_v63 }
 0x7af   :  { %2902 = vpow2.f32 %v1886_v36  ;;  %v1888_v50 = vmul.f32 1.442695, %v3723_v51 }
 0x7b1   :  { %v2899_v11 = vpop.eup %2898  ;;  %2904 = vpow2.f32 %v1888_v50 }
 0x7b2   :  { %1946 = vadd.xlane.f32.xlu0 %v2899_v11  ;;  %v1795_v12 = vpop.xlane.xlu0 %1794 }
 0x7b3   :  { %v2901_v45 = vpop.eup %2900  ;;  %v3727_v18 = vsub.f32 %v3599_v17, %v1795_v12 }
 0x7b4   :  { %v1797_v61 = vpop.xlane.xlu1 %1796  ;;  %1948 = vadd.xlane.f32.xlu1 %v2901_v45 }
 0x7b5   :  { %v1890_v22 = vmul.f32 1.442695, %v3727_v18  ;;  %v3731_v19 = vsub.f32 %v3603_v20, %v1797_v61 }
 0x7b7   :  { %2906 = vpow2.f32 %v1890_v22  ;;  %v1892_v56 = vmul.f32 1.442695, %v3731_v19 }
 0x7b9   :  { %v2903_v26 = vpop.eup %2902  ;;  %2908 = vpow2.f32 %v1892_v56 }
 0x7ba   :  { %1950 = vadd.xlane.f32.xlu0 %v2903_v26  ;;  %v1799_v27 = vpop.xlane.xlu0 %1798 }
 0x7bb   :  { %v2905_v29 = vpop.eup %2904  ;;  %v3735_v31 = vsub.f32 %v3607_v34, %v1799_v27 }
 0x7bc   :  { %v1801_v17 = vpop.xlane.xlu1 %1800  ;;  %1952 = vadd.xlane.f32.xlu1 %v2905_v29 }
 0x7bd   :  { %v1894_v37 = vmul.f32 1.442695, %v3735_v31  ;;  %v3739_v32 = vsub.f32 %v3611_v35, %v1801_v17 }
 0x7bf   :  { %2910 = vpow2.f32 %v1894_v37  ;;  %v1896_v20 = vmul.f32 1.442695, %v3739_v32 }
 0x7c1   :  { %v2907_v40 = vpop.eup %2906  ;;  %2912 = vpow2.f32 %v1896_v20 }
 0x7c2   :  { %1954 = vadd.xlane.f32.xlu0 %v2907_v40  ;;  %v1803_v43 = vpop.xlane.xlu0 %1802 }
 0x7c3   :  { %v2909_v62 = vpop.eup %2908  ;;  %v3743_v41 = vsub.f32 %v3615_v1, %v1803_v43 }
 0x7c4   :  { %v1805_v34 = vpop.xlane.xlu1 %1804  ;;  %1956 = vadd.xlane.f32.xlu1 %v2909_v62 }
 0x7c5   :  { %v1898_v3 = vmul.f32 1.442695, %v3743_v41  ;;  %v3747_v42 = vsub.f32 %v3619_v2, %v1805_v34 }
 0x7c7   :  { %2914 = vpow2.f32 %v1898_v3  ;;  %v1900_v35 = vmul.f32 1.442695, %v3747_v42 }
 0x7c9   :  { %v2911_v10 = vpop.eup %2910  ;;  %2916 = vpow2.f32 %v1900_v35 }
 0x7ca   :  { %1958 = vadd.xlane.f32.xlu0 %v2911_v10 }
 0x7cb   :  { %v2913_v16 = vpop.eup %2912 }
 0x7cc   :  { %1960 = vadd.xlane.f32.xlu1 %v2913_v16 }
 0x7d1   :  { %v2915_v47 = vpop.eup %2914 }
 0x7d2   :  { %1962 = vadd.xlane.f32.xlu0 %v2915_v47 }
 0x7d3   :  { %v2917_v4 = vpop.eup %2916 }
 0x7d4   :  { %1964 = vadd.xlane.f32.xlu1 %v2917_v4 }
 0x7e7   :  { %v1903_v1 = vpop.xlane.xlu0 %1902 }
 0x7e8   :  { %2918 = vlog2.f32 %v1903_v1 }
 0x7eb   :  { %v1905_v55 = vpop.xlane.xlu1 %1904 }
 0x7ec   :  { %2920 = vlog2.f32 %v1905_v55 }
 0x7ef   :  { %v1907_v48 = vpop.xlane.xlu0 %1906 }
 0x7f0   :  { %2922 = vlog2.f32 %v1907_v48 }
 0x7f2   :  { %v2919_v2 = vpop.eup %2918 }
 0x7f3   :  { %v1967_v58 = vmul.f32 0.6931472, %v2919_v2  ;;  %v1909_v30 = vpop.xlane.xlu1 %1908 }
 0x7f4   :  { %2924 = vlog2.f32 %v1909_v30 }
 0x7f5   :  { %v2030_v7 = vsub.f32 %v3623_v8, %v1967_v58 }
 0x7f6   :  { %v2921_v63 = vpop.eup %2920 }
 0x7f7   :  { %2062 = vst [vmem:[#allocation11] sm:$0xff] %v2030_v7  ;;  %v1969_v36 = vmul.f32 0.6931472, %v2921_v63  ;;  %v1911_v50 = vpop.xlane.xlu0 %1910 }
 0x7f8   :  { %2926 = vlog2.f32 %v1911_v50 }
 0x7f9   :  { %v2031_v11 = vsub.f32 %v3627_v15, %v1969_v36  ;;  %v1913_v12 = vpop.xlane.xlu1 %1912 }
 0x7fa   :  { %v2923_v45 = vpop.eup %2922  ;;  %2928 = vlog2.f32 %v1913_v12 }
 0x7fb   :  { %2063 = vst [vmem:[#allocation11 + $0x8] sm:$0xff] %v2031_v11  ;;  %v1971_v61 = vmul.f32 0.6931472, %v2923_v45 }
 0x7fd   :  { %v2032_v22 = vsub.f32 %v3631_v21, %v1971_v61 }
 0x7fe   :  { %v2925_v56 = vpop.eup %2924 }
 0x7ff   :  { %2064 = vst [vmem:[#allocation11 + $0x10] sm:$0xff] %v2032_v22  ;;  %v1973_v26 = vmul.f32 0.6931472, %v2925_v56  ;;  %v1915_v27 = vpop.xlane.xlu0 %1914 }
 0x800   :  { %2930 = vlog2.f32 %v1915_v27 }
 0x801   :  { %v2033_v8 = vsub.f32 %v3635_v28, %v1973_v26  ;;  %v1917_v29 = vpop.xlane.xlu1 %1916 }
 0x802   :  { %v2927_v17 = vpop.eup %2926  ;;  %2932 = vlog2.f32 %v1917_v29 }
 0x803   :  { %2065 = vst [vmem:[#allocation11 + $0x18] sm:$0xff] %v2033_v8  ;;  %v1975_v37 = vmul.f32 0.6931472, %v2927_v17 }
 0x804   :  { %v2929_v15 = vpop.eup %2928 }
 0x805   :  { %v2034_v20 = vsub.f32 %v3639_v59, %v1975_v37  ;;  %v1977_v40 = vmul.f32 0.6931472, %v2929_v15 }
 0x807   :  { %2066 = vst [vmem:[#allocation11 + $0x20] sm:$0xff] %v2034_v20  ;;  %v2035_v43 = vsub.f32 %v3643_v25, %v1977_v40  ;;  %v1919_v21 = vpop.xlane.xlu0 %1918 }
 0x808   :  { %2934 = vlog2.f32 %v1919_v21 }
 0x809   :  { %2067 = vst [vmem:[#allocation11 + $0x28] sm:$0xff] %v2035_v43  ;;  %v1921_v62 = vpop.xlane.xlu1 %1920 }
 0x80a   :  { %v2931_v34 = vpop.eup %2930  ;;  %2936 = vlog2.f32 %v1921_v62 }
 0x80b   :  { %v1979_v3 = vmul.f32 0.6931472, %v2931_v34 }
 0x80c   :  { %v2933_v28 = vpop.eup %2932 }
 0x80d   :  { %v2036_v35 = vsub.f32 %v3647_v13, %v1979_v3  ;;  %v1981_v10 = vmul.f32 0.6931472, %v2933_v28 }
 0x80f   :  { %2068 = vst [vmem:[#allocation11 + $0x30] sm:$0xff] %v2036_v35  ;;  %v2037_v16 = vsub.f32 %v3651_v23, %v1981_v10  ;;  %v1923_v47 = vpop.xlane.xlu0 %1922 }
 0x810   :  { %2938 = vlog2.f32 %v1923_v47 }
 0x811   :  { %2069 = vst [vmem:[#allocation11 + $0x38] sm:$0xff] %v2037_v16  ;;  %v1925_v59 = vpop.xlane.xlu1 %1924 }
 0x812   :  { %v2935_v4 = vpop.eup %2934  ;;  %2940 = vlog2.f32 %v1925_v59 }
 0x813   :  { %v1983_v25 = vmul.f32 0.6931472, %v2935_v4 }
 0x814   :  { %v2937_v1 = vpop.eup %2936 }
 0x815   :  { %v2038_v55 = vsub.f32 %v3655_v33, %v1983_v25  ;;  %v1985_v48 = vmul.f32 0.6931472, %v2937_v1 }
 0x817   :  { %2070 = vst [vmem:[#allocation11 + $0x40] sm:$0xff] %v2038_v55  ;;  %v2039_v2 = vsub.f32 %v3659_v39, %v1985_v48  ;;  %v1927_v58 = vpop.xlane.xlu0 %1926 }
 0x818   :  { %2942 = vlog2.f32 %v1927_v58 }
 0x819   :  { %2071 = vst [vmem:[#allocation11 + $0x48] sm:$0xff] %v2039_v2  ;;  %v1929_v13 = vpop.xlane.xlu1 %1928 }
 0x81a   :  { %v2939_v30 = vpop.eup %2938  ;;  %2944 = vlog2.f32 %v1929_v13 }
 0x81b   :  { %v1987_v23 = vmul.f32 0.6931472, %v2939_v30 }
 0x81c   :  { %v2941_v7 = vpop.eup %2940 }
 0x81d   :  { %v2040_v63 = vsub.f32 %v3663_v0, %v1987_v23  ;;  %v1989_v36 = vmul.f32 0.6931472, %v2941_v7 }
 0x81f   :  { %2072 = vst [vmem:[#allocation11 + $0x50] sm:$0xff] %v2040_v63  ;;  %v2041_v50 = vsub.f32 %v3667_v9, %v1989_v36  ;;  %v1931_v11 = vpop.xlane.xlu0 %1930 }
 0x820   :  { %2946 = vlog2.f32 %v1931_v11 }
 0x821   :  { %2073 = vst [vmem:[#allocation11 + $0x58] sm:$0xff] %v2041_v50  ;;  %v1933_v33 = vpop.xlane.xlu1 %1932 }
 0x822   :  { %v2943_v12 = vpop.eup %2942  ;;  %2948 = vlog2.f32 %v1933_v33 }
 0x823   :  { %v1991_v39 = vmul.f32 0.6931472, %v2943_v12 }
 0x824   :  { %v2945_v45 = vpop.eup %2944 }
 0x825   :  { %v2042_v61 = vsub.f32 %v3671_v53, %v1991_v39  ;;  %v1993_v22 = vmul.f32 0.6931472, %v2945_v45 }
 0x827   :  { %2074 = vst [vmem:[#allocation11 + $0x60] sm:$0xff] %v2042_v61  ;;  %v2043_v56 = vsub.f32 %v3675_v57, %v1993_v22  ;;  %v1935_v26 = vpop.xlane.xlu0 %1934 }
 0x828   :  { %2950 = vlog2.f32 %v1935_v26 }
 0x829   :  { %2075 = vst [vmem:[#allocation11 + $0x68] sm:$0xff] %v2043_v56  ;;  %v1937_v0 = vpop.xlane.xlu1 %1936 }
 0x82a   :  { %v2947_v27 = vpop.eup %2946  ;;  %2952 = vlog2.f32 %v1937_v0 }
 0x82b   :  { %v1995_v9 = vmul.f32 0.6931472, %v2947_v27 }
 0x82c   :  { %v2949_v8 = vpop.eup %2948 }
 0x82d   :  { %v2044_v29 = vsub.f32 %v3679_v24, %v1995_v9  ;;  %v1997_v17 = vmul.f32 0.6931472, %v2949_v8 }
 0x82f   :  { %2076 = vst [vmem:[#allocation11 + $0x70] sm:$0xff] %v2044_v29  ;;  %v2045_v37 = vsub.f32 %v3683_v38, %v1997_v17  ;;  %v1939_v15 = vpop.xlane.xlu0 %1938 }
 0x830   :  { %2954 = vlog2.f32 %v1939_v15 }
 0x831   :  { %2077 = vst [vmem:[#allocation11 + $0x78] sm:$0xff] %v2045_v37  ;;  %v1941_v53 = vpop.xlane.xlu1 %1940 }
 0x832   :  { %v2951_v20 = vpop.eup %2950  ;;  %2956 = vlog2.f32 %v1941_v53 }
 0x833   :  { %v1999_v57 = vmul.f32 0.6931472, %v2951_v20 }
 0x834   :  { %v2953_v40 = vpop.eup %2952 }
 0x835   :  { %v2046_v43 = vsub.f32 %v3687_v14, %v1999_v57  ;;  %v2001_v21 = vmul.f32 0.6931472, %v2953_v40 }
 0x837   :  { %2078 = vst [vmem:[#allocation11 + $0x80] sm:$0xff] %v2046_v43  ;;  %v2047_v62 = vsub.f32 %v3691_v60, %v2001_v21  ;;  %v1943_v34 = vpop.xlane.xlu0 %1942 }
 0x838   :  { %2958 = vlog2.f32 %v1943_v34 }
 0x839   :  { %2079 = vst [vmem:[#allocation11 + $0x88] sm:$0xff] %v2047_v62  ;;  %v1945_v24 = vpop.xlane.xlu1 %1944 }
 0x83a   :  { %v2955_v3 = vpop.eup %2954  ;;  %2960 = vlog2.f32 %v1945_v24 }
 0x83b   :  { %v2003_v38 = vmul.f32 0.6931472, %v2955_v3 }
 0x83c   :  { %v2957_v28 = vpop.eup %2956 }
 0x83d   :  { %v2048_v35 = vsub.f32 %v3695_v5, %v2003_v38  ;;  %v2005_v10 = vmul.f32 0.6931472, %v2957_v28 }
 0x83f   :  { %2080 = vst [vmem:[#allocation11 + $0x90] sm:$0xff] %v2048_v35  ;;  %v2049_v16 = vsub.f32 %v3699_v6, %v2005_v10  ;;  %v1947_v47 = vpop.xlane.xlu0 %1946 }
 0x840   :  { %2962 = vlog2.f32 %v1947_v47 }
 0x841   :  { %2081 = vst [vmem:[#allocation11 + $0x98] sm:$0xff] %v2049_v16  ;;  %v1949_v14 = vpop.xlane.xlu1 %1948 }
 0x842   :  { %v2959_v59 = vpop.eup %2958  ;;  %2964 = vlog2.f32 %v1949_v14 }
 0x843   :  { %v2007_v60 = vmul.f32 0.6931472, %v2959_v59 }
 0x844   :  { %v2961_v4 = vpop.eup %2960 }
 0x845   :  { %v2050_v25 = vsub.f32 %v3703_v44, %v2007_v60  ;;  %v2009_v1 = vmul.f32 0.6931472, %v2961_v4 }
 0x847   :  { %2082 = vst [vmem:[#allocation11 + $0xa0] sm:$0xff] %v2050_v25  ;;  %v2051_v55 = vsub.f32 %v3707_v46, %v2009_v1  ;;  %v1951_v48 = vpop.xlane.xlu0 %1950 }
 0x848   :  { %2966 = vlog2.f32 %v1951_v48 }
 0x849   :  { %2083 = vst [vmem:[#allocation11 + $0xa8] sm:$0xff] %v2051_v55  ;;  %v1953_v5 = vpop.xlane.xlu1 %1952 }
 0x84a   :  { %v2963_v2 = vpop.eup %2962  ;;  %2968 = vlog2.f32 %v1953_v5 }
 0x84b   :  { %v2011_v6 = vmul.f32 0.6931472, %v2963_v2 }
 0x84c   :  { %v2965_v58 = vpop.eup %2964 }
 0x84d   :  { %v2052_v13 = vsub.f32 %v3711_v49, %v2011_v6  ;;  %v2013_v30 = vmul.f32 0.6931472, %v2965_v58 }
 0x84f   :  { %2084 = vst [vmem:[#allocation11 + $0xb0] sm:$0xff] %v2052_v13  ;;  %v2053_v23 = vsub.f32 %v3715_v52, %v2013_v30  ;;  %v1955_v7 = vpop.xlane.xlu0 %1954 }
 0x850   :  { %2970 = vlog2.f32 %v1955_v7 }
 0x851   :  { %2085 = vst [vmem:[#allocation11 + $0xb8] sm:$0xff] %v2053_v23  ;;  %v1957_v44 = vpop.xlane.xlu1 %1956 }
 0x852   :  { %v2967_v63 = vpop.eup %2966  ;;  %2972 = vlog2.f32 %v1957_v44 }
 0x853   :  { %v2015_v46 = vmul.f32 0.6931472, %v2967_v63 }
 0x854   :  { %v2969_v36 = vpop.eup %2968 }
 0x855   :  { %v2054_v50 = vsub.f32 %v3719_v54, %v2015_v46  ;;  %v2017_v11 = vmul.f32 0.6931472, %v2969_v36 }
 0x857   :  { %2086 = vst [vmem:[#allocation11 + $0xc0] sm:$0xff] %v2054_v50  ;;  %v2055_v33 = vsub.f32 %v3723_v51, %v2017_v11  ;;  %v1959_v12 = vpop.xlane.xlu0 %1958 }
 0x858   :  { %2974 = vlog2.f32 %v1959_v12 }
 0x859   :  { %2087 = vst [vmem:[#allocation11 + $0xc8] sm:$0xff] %v2055_v33  ;;  %v1961_v49 = vpop.xlane.xlu1 %1960 }
 0x85a   :  { %v2971_v39 = vpop.eup %2970  ;;  %2976 = vlog2.f32 %v1961_v49 }
 0x85b   :  { %v2019_v52 = vmul.f32 0.6931472, %v2971_v39 }
 0x85c   :  { %v2973_v45 = vpop.eup %2972 }
 0x85d   :  { %v2056_v61 = vsub.f32 %v3727_v18, %v2019_v52  ;;  %v2021_v22 = vmul.f32 0.6931472, %v2973_v45 }
 0x85f   :  { %2088 = vst [vmem:[#allocation11 + $0xd0] sm:$0xff] %v2056_v61  ;;  %v2057_v56 = vsub.f32 %v3731_v19, %v2021_v22  ;;  %v1963_v26 = vpop.xlane.xlu0 %1962 }
 0x860   :  { %2978 = vlog2.f32 %v1963_v26 }
 0x861   :  { %2089 = vst [vmem:[#allocation11 + $0xd8] sm:$0xff] %v2057_v56  ;;  %v1965_v54 = vpop.xlane.xlu1 %1964 }
 0x862   :  { %v2975_v0 = vpop.eup %2974  ;;  %2980 = vlog2.f32 %v1965_v54 }
 0x863   :  { %v2023_v51 = vmul.f32 0.6931472, %v2975_v0 }
 0x864   :  { %v2977_v27 = vpop.eup %2976 }
 0x865   :  { %v2058_v9 = vsub.f32 %v3735_v31, %v2023_v51  ;;  %v2025_v8 = vmul.f32 0.6931472, %v2977_v27 }
 0x867   :  { %2090 = vst [vmem:[#allocation11 + $0xe0] sm:$0xff] %v2058_v9  ;;  %v2059_v29 = vsub.f32 %v3739_v32, %v2025_v8 }
 0x869   :  { %2091 = vst [vmem:[#allocation11 + $0xe8] sm:$0xff] %v2059_v29 }
 0x86a   :  { %v2979_v18 = vpop.eup %2978 }
 0x86b   :  { %v2027_v17 = vmul.f32 0.6931472, %v2979_v18 }
 0x86c   :  { %v2981_v37 = vpop.eup %2980 }
 0x86d   :  { %v2060_v19 = vsub.f32 %v3743_v41, %v2027_v17  ;;  %v2029_v15 = vmul.f32 0.6931472, %v2981_v37 }
 0x86f   :  { %2092 = vst [vmem:[#allocation11 + $0xf0] sm:$0xff] %v2060_v19  ;;  %v2061_v53 = vsub.f32 %v3747_v42, %v2029_v15 }
 0x871   :  { %2093 = vst [vmem:[#allocation11 + $0xf8] sm:$0xff] %v2061_v53 }
 0x872   :  { %3135 = shalt.err (!%p3132_p2)
}
 0x873   :  { %s3136_s10 = scalar_lea.hbm %s3805_s8, 4096 }
 0x874   :  { %p3137_p3 = scmp.ne.s32.totalorder %s3805_s8, %s3136_s10  ;;  %p3140_p4 = scmp.lt.u32.totalorder %s3136_s10, %s3805_s8 }
 0x876   :  { %p3142_p5 = pnand %p3140_p4, %p3137_p3 }
 0x878   :  { %3145 = shalt.err (!%p3142_p5)
}
 0x879   :  { %2105 = dma.vmem_to_hbm [thread:$0]  %s2100_s27, 4096, %s3805_s8, [#allocation4], %s3155_s15, %s3155_s15, %s3156_s16  }
 0x87a   :  { %3152 = dma.done.wait [#allocation4], 4096  }
 0x87b   :  { %3153 = vsyncadd [#allocation4], 4294963200 }
 0x87c   :  { %2109 = vsyncpa [#allocation3], 1 }
 0x87d   :  { %2110 = vsyncpa [#allocation6], 1 }
 0x87e   :  { %2111 = vsyncpa [#allocation9], 1 }
 0x87f   :  { %2112 = vsyncpa [#allocation4], 1 }

</bundles_post_ra>
